<compile_context>
chip_gen: v5e
topology: v5e:2x2
jax: 0.10.0
libtpu: 0.0.40
codegen_flags: <defaults>
</compile_context>

<pallas_src>
import jax
import jax.numpy as jnp
from jax.experimental import pallas as pl
from jax.experimental.pallas import tpu as pltpu

CARDINALITY = 32        # BottleneckX.cardinality
BN_EPS = 1e-5


# ----------------------------------------------------------------------------
# Parameter construction (PyTorch layouts) and host-side folding for the kernel
# ----------------------------------------------------------------------------
def init_bottleneckx_params(key, inplanes, planes):
    """Deterministic synthetic params with BottleneckX.__init__ shapes."""
    bottle_planes = planes * CARDINALITY // CARDINALITY   # == planes
    k = jax.random.split(key, 6)
    w1 = 0.1 * jax.random.normal(k[0], (bottle_planes, inplanes, 1, 1), jnp.float32)
    w2 = 0.1 * jax.random.normal(
        k[1], (bottle_planes, bottle_planes // CARDINALITY, 3, 3), jnp.float32)
    w3 = 0.1 * jax.random.normal(k[2], (planes, bottle_planes, 1, 1), jnp.float32)

    def bn(kg, c):
        kg1, kg2 = jax.random.split(kg)
        gamma = 1.0 + 0.1 * jax.random.normal(kg1, (c,), jnp.float32)
        beta = 0.05 * jnp.arange(c, dtype=jnp.float32)
        mean = 0.01 * jnp.arange(c, dtype=jnp.float32)
        var = 1.0 + 0.1 * jnp.abs(jax.random.normal(kg2, (c,), jnp.float32))
        return dict(gamma=gamma, beta=beta, mean=mean, var=var)

    return dict(w1=w1, w2=w2, w3=w3,
                bn1=bn(k[3], bottle_planes),
                bn2=bn(k[4], bottle_planes),
                bn3=bn(k[5], planes))


def _bn_fold(bn):
    scale = bn["gamma"] / jnp.sqrt(bn["var"] + BN_EPS)
    bias = bn["beta"] - bn["mean"] * scale
    return scale, bias


def prepare_kernel_params(params):
    """Fold inference-mode BN into the conv weights; pack compact kernel params."""
    s1, b1 = _bn_fold(params["bn1"])
    s2, b2 = _bn_fold(params["bn2"])
    s3, b3 = _bn_fold(params["bn3"])

    cb, cin = params["w1"].shape[:2]
    cout = params["w3"].shape[0]
    cin_g = params["w2"].shape[1]          # channels per group (1 => depthwise)

    # 1x1 convs -> bf16 MXU weights (f32 accumulation in-kernel).
    m1 = (s1[:, None] * params["w1"].reshape(cb, cin)).astype(jnp.bfloat16)
    m3 = (s3[:, None] * params["w3"].reshape(cout, cb)).astype(jnp.bfloat16)

    # Compact per-tap grouped conv2 weight: (9, Cb, Cin_g), tap index = kh*3+kw.
    w2 = jnp.transpose(params["w2"].reshape(cb, cin_g, 9), (2, 0, 1))
    w2 = w2 * s2[None, :, None]
    # Depthwise path (cin_g == 1) runs on the VPU -> keep f32 (v5e has no bf16
    # VALU); the general grouped path feeds the MXU -> bf16.
    w2 = w2.astype(jnp.float32 if cin_g == 1 else jnp.bfloat16)

    f32 = jnp.float32
    return dict(m1=m1, c1=b1[:, None].astype(f32),
                w2=w2, c2=b2[:, None].astype(f32),
                m3=m3, c3=b3[:, None].astype(f32))


# ----------------------------------------------------------------------------
# Fused Pallas kernel
# ----------------------------------------------------------------------------
def bottleneckx_forward(x_nchw, kp, residual=None):
    """BottleneckX.forward(x) with stride=1, dilation=1 (residual = x)."""
    if residual is not None:
        raise NotImplementedError("only the default residual (= x) path")
    N, C_in, H, W = x_nchw.shape
    Cb = kp["m1"].shape[0]
    Cout = kp["m3"].shape[0]
    cin_g = kp["w2"].shape[2]
    groups = Cb // cin_g                      # == CARDINALITY
    assert Cout == C_in, "residual add requires inplanes == planes"
    HW = H * W

    # Host-precomputed zero-pad boundary masks, one (1, HW) row per tap, and
    # the per-tap lane shifts.  DMA'd once, VMEM-resident (constant index_map).
    lin = jnp.arange(HW, dtype=jnp.int32)
    hh, ww = lin // W, lin % W
    shifts, masks = [], []
    for dh in (-1, 0, 1):
        for dw in (-1, 0, 1):
            shifts.append(dh * W + dw)
            valid = ((hh + dh >= 0) & (hh + dh < H) &
                     (ww + dw >= 0) & (ww + dw < W))
            masks.append(valid.astype(jnp.float32))
    tap_mask = jnp.stack(masks).reshape(9, 1, HW)

    def kernel(x_ref, m1_ref, c1_ref, w2_ref, c2_ref, m3_ref, c3_ref,
               msk_ref, o_ref):
        x = x_ref[0]                                              # (Cin, HW) f32

        # --- conv1 (1x1) + bn1 + relu : bf16 MXU, f32 accumulate ------------
        h1 = jnp.dot(m1_ref[...], x.astype(jnp.bfloat16),
                     preferred_element_type=jnp.float32)
        h1 = jnp.maximum(h1 + c1_ref[...], 0.0)                   # (Cb, HW) f32

        # --- conv2 (3x3, groups=32, pad=1) + bn2 + relu ---------------------
        # Tap accumulation: only one shifted tap live at a time (no im2col),
        # XLU roll of tap t+1 overlaps the FMA / matmul of tap t.
        acc = jnp.zeros((Cb, HW), jnp.float32)
        for t, s in enumerate(shifts):
            shifted = h1 if s == 0 else pltpu.roll(h1, (-s) % HW, axis=1)
            tap = shifted if s == 0 else msk_ref[t] * shifted     # zero-pad halo
            if cin_g == 1:
                # Depthwise (1 channel / group): per-channel VPU FMA.
                acc = acc + w2_ref[t] * tap
            else:
                # TODO(synk): general grouped path (Cin_g > 1) -- per-tap
                # batched matmul over groups; not exercised at the test size.
                wt = w2_ref[t].reshape(groups, cin_g, cin_g)
                tg = tap.astype(jnp.bfloat16).reshape(groups, cin_g, HW)
                acc = acc + jax.lax.dot_general(
                    wt, tg, (((2,), (1,)), ((0,), (0,))),
                    preferred_element_type=jnp.float32).reshape(Cb, HW)
        h2 = jnp.maximum(acc + c2_ref[...], 0.0)                  # (Cb, HW) f32

        # --- conv3 (1x1) + bn3 + residual + relu ----------------------------
        h3 = jnp.dot(m3_ref[...], h2.astype(jnp.bfloat16),
                     preferred_element_type=jnp.float32)
        o_ref[0] = jnp.maximum(h3 + c3_ref[...] + x, 0.0)         # residual = x

    out = pl.pallas_call(
        kernel,
        out_shape=jax.ShapeDtypeStruct((N, Cout, HW), jnp.float32),
        grid=(N,),
        in_specs=[
            pl.BlockSpec((1, C_in, HW), lambda i: (i, 0, 0)),      # x (per image)
            pl.BlockSpec((Cb, C_in), lambda i: (0, 0)),            # m1 (bf16)
            pl.BlockSpec((Cb, 1), lambda i: (0, 0)),               # c1
            pl.BlockSpec((9, Cb, cin_g), lambda i: (0, 0, 0)),     # w2 per-tap
            pl.BlockSpec((Cb, 1), lambda i: (0, 0)),               # c2
            pl.BlockSpec((Cout, Cb), lambda i: (0, 0)),            # m3 (bf16)
            pl.BlockSpec((Cout, 1), lambda i: (0, 0)),             # c3
            pl.BlockSpec((9, 1, HW), lambda i: (0, 0, 0)),         # halo masks
        ],
        out_specs=pl.BlockSpec((1, Cout, HW), lambda i: (i, 0, 0)),
        compiler_params=pltpu.CompilerParams(
            dimension_semantics=("parallel",)),                    # megacore / v7x
    )(x_nchw.reshape(N, C_in, HW),
      kp["m1"], kp["c1"], kp["w2"], kp["c2"], kp["m3"], kp["c3"], tap_mask)
    return out.reshape(N, Cout, H, W)


# ----------------------------------------------------------------------------
# Pure-JAX reference (independent math) for correctness
# ----------------------------------------------------------------------------
def _reference_forward(x, params):
    def conv(inp, w, padding, groups=1):
        return jax.lax.conv_general_dilated(
            inp, w, window_strides=(1, 1), padding=padding,
            dimension_numbers=("NCHW", "OIHW", "NCHW"),
            feature_group_count=groups,
            precision=jax.lax.Precision.HIGHEST)

    def bn(o, b):
        scale = b["gamma"] / jnp.sqrt(b["var"] + BN_EPS)
        bias = b["beta"] - b["mean"] * scale
        return o * scale[None, :, None, None] + bias[None, :, None, None]

    residual = x
    o = jax.nn.relu(bn(conv(x, params["w1"], "VALID"), params["bn1"]))
    o = jax.nn.relu(bn(conv(o, params["w2"], [(1, 1), (1, 1)],
                            groups=CARDINALITY), params["bn2"]))
    o = bn(conv(o, params["w3"], "VALID"), params["bn3"]) + residual
    return jax.nn.relu(o)


if __name__ == "__main__":
    key = jax.random.PRNGKey(0)
    k_x, k_p = jax.random.split(key)

    # channels must be a multiple of cardinality=32; inplanes == planes (stride=1)
    N, C, H, W = 2, 32, 16, 16
    x = jax.random.normal(k_x, (N, C, H, W), jnp.float32)
    params = init_bottleneckx_params(k_p, inplanes=C, planes=C)
    kparams = prepare_kernel_params(params)

    out = jax.block_until_ready(bottleneckx_forward(x, kparams))
    ref = jax.block_until_ready(_reference_forward(x, params))

    assert out.shape == (N, C, H, W)
    err = float(jnp.max(jnp.abs(out - ref)))
    # conv1/conv3 run with bf16 MXU operands (f32 accumulation), so the
    # tolerance vs. the full-f32 reference is bf16-scale rather than 5e-3.
    assert err < 6e-2, f"max abs err {err}"

    print("KERNEL_OK")
</pallas_src>

<mosaic_0001>
module attributes {stable_mosaic.version = 11 : i64} {
  func.func @kernel(%arg0: i32, %arg1: memref<1x32x256xf32, #tpu.memory_space<vmem>>, %arg2: memref<32x32xbf16, #tpu.memory_space<vmem>>, %arg3: memref<32x1xf32, #tpu.memory_space<vmem>>, %arg4: memref<9x32x1xf32, #tpu.memory_space<vmem>>, %arg5: memref<32x1xf32, #tpu.memory_space<vmem>>, %arg6: memref<32x32xbf16, #tpu.memory_space<vmem>>, %arg7: memref<32x1xf32, #tpu.memory_space<vmem>>, %arg8: memref<9x1x256xf32, #tpu.memory_space<vmem>>, %arg9: memref<1x32x256xf32, #tpu.memory_space<vmem>>) attributes {dimension_semantics = [#tpu.dimension_semantics<parallel>], iteration_bounds = array<i64: 2>, scalar_prefetch = 0 : i64, scratch_operands = 0 : i64, tpu.core_type = #tpu.core_type<tc>, window_params = [{transform_indices = @transform_0, window_bounds = array<i64: 1, 32, 256>}, {pipeline_mode = #tpu.pipeline_mode<synchronous>, transform_indices = @transform_1, window_bounds = array<i64: 32, 32>}, {pipeline_mode = #tpu.pipeline_mode<synchronous>, transform_indices = @transform_2, window_bounds = array<i64: 32, 1>}, {pipeline_mode = #tpu.pipeline_mode<synchronous>, transform_indices = @transform_3, window_bounds = array<i64: 9, 32, 1>}, {pipeline_mode = #tpu.pipeline_mode<synchronous>, transform_indices = @transform_4, window_bounds = array<i64: 32, 1>}, {pipeline_mode = #tpu.pipeline_mode<synchronous>, transform_indices = @transform_5, window_bounds = array<i64: 32, 32>}, {pipeline_mode = #tpu.pipeline_mode<synchronous>, transform_indices = @transform_6, window_bounds = array<i64: 32, 1>}, {pipeline_mode = #tpu.pipeline_mode<synchronous>, transform_indices = @transform_7, window_bounds = array<i64: 9, 1, 256>}, {transform_indices = @transform_8, window_bounds = array<i64: 1, 32, 256>}]} {
    %c0 = arith.constant 0 : index
    %c0_0 = arith.constant 0 : index
    %c0_1 = arith.constant 0 : index
    %0 = vector.load %arg1[%c0, %c0_0, %c0_1] : memref<1x32x256xf32, #tpu.memory_space<vmem>>, vector<1x32x256xf32>
    %1 = vector.shape_cast %0 : vector<1x32x256xf32> to vector<32x256xf32>
    %c0_2 = arith.constant 0 : index
    %c0_3 = arith.constant 0 : index
    %2 = vector.load %arg2[%c0_2, %c0_3] : memref<32x32xbf16, #tpu.memory_space<vmem>>, vector<32x32xbf16>
    %3 = arith.truncf %1 : vector<32x256xf32> to vector<32x256xbf16>
    %cst = arith.constant dense<0.000000e+00> : vector<32x256xf32>
    %4 = tpu.matmul %2, %3, %cst {dimension_numbers = #tpu.dot_dimension_numbers<[1], [0], [0], [1], [0, 0, 1, 1], [], []>} : vector<32x32xbf16>, vector<32x256xbf16>, vector<32x256xf32> -> vector<32x256xf32>
    %c0_4 = arith.constant 0 : index
    %c0_5 = arith.constant 0 : index
    %5 = vector.load %arg3[%c0_4, %c0_5] : memref<32x1xf32, #tpu.memory_space<vmem>>, vector<32x1xf32>
    %6 = vector.broadcast %5 : vector<32x1xf32> to vector<32x256xf32>
    %7 = arith.addf %4, %6 : vector<32x256xf32>
    %cst_6 = arith.constant 0.000000e+00 : f32
    %8 = vector.broadcast %cst_6 : f32 to vector<32x256xf32>
    %9 = arith.maximumf %7, %8 : vector<32x256xf32>
    %cst_7 = arith.constant 0.000000e+00 : f32
    %10 = vector.broadcast %cst_7 : f32 to vector<32x256xf32>
    %c17_i32 = arith.constant 17 : i32
    %11 = tpu.dynamic_rotate %9 by %c17_i32 dim 1 : vector<32x256xf32>, i32 -> vector<32x256xf32>
    %c0_8 = arith.constant 0 : index
    %c0_9 = arith.constant 0 : index
    %c0_10 = arith.constant 0 : index
    %12 = vector.load %arg8[%c0_8, %c0_9, %c0_10] : memref<9x1x256xf32, #tpu.memory_space<vmem>>, vector<1x1x256xf32>
    %13 = vector.shape_cast %12 : vector<1x1x256xf32> to vector<1x256xf32>
    %14 = vector.broadcast %13 : vector<1x256xf32> to vector<32x256xf32>
    %15 = arith.mulf %14, %11 : vector<32x256xf32>
    %c0_11 = arith.constant 0 : index
    %c0_12 = arith.constant 0 : index
    %c0_13 = arith.constant 0 : index
    %16 = vector.load %arg4[%c0_11, %c0_12, %c0_13] : memref<9x32x1xf32, #tpu.memory_space<vmem>>, vector<1x32x1xf32>
    %17 = vector.shape_cast %16 : vector<1x32x1xf32> to vector<32x1xf32>
    %18 = vector.broadcast %17 : vector<32x1xf32> to vector<32x256xf32>
    %19 = arith.mulf %18, %15 : vector<32x256xf32>
    %20 = arith.addf %10, %19 : vector<32x256xf32>
    %c16_i32 = arith.constant 16 : i32
    %21 = tpu.dynamic_rotate %9 by %c16_i32 dim 1 : vector<32x256xf32>, i32 -> vector<32x256xf32>
    %c1 = arith.constant 1 : index
    %c0_14 = arith.constant 0 : index
    %c0_15 = arith.constant 0 : index
    %22 = vector.load %arg8[%c1, %c0_14, %c0_15] : memref<9x1x256xf32, #tpu.memory_space<vmem>>, vector<1x1x256xf32>
    %23 = vector.shape_cast %22 : vector<1x1x256xf32> to vector<1x256xf32>
    %24 = vector.broadcast %23 : vector<1x256xf32> to vector<32x256xf32>
    %25 = arith.mulf %24, %21 : vector<32x256xf32>
    %c1_16 = arith.constant 1 : index
    %c0_17 = arith.constant 0 : index
    %c0_18 = arith.constant 0 : index
    %26 = vector.load %arg4[%c1_16, %c0_17, %c0_18] : memref<9x32x1xf32, #tpu.memory_space<vmem>>, vector<1x32x1xf32>
    %27 = vector.shape_cast %26 : vector<1x32x1xf32> to vector<32x1xf32>
    %28 = vector.broadcast %27 : vector<32x1xf32> to vector<32x256xf32>
    %29 = arith.mulf %28, %25 : vector<32x256xf32>
    %30 = arith.addf %20, %29 : vector<32x256xf32>
    %c15_i32 = arith.constant 15 : i32
    %31 = tpu.dynamic_rotate %9 by %c15_i32 dim 1 : vector<32x256xf32>, i32 -> vector<32x256xf32>
    %c2 = arith.constant 2 : index
    %c0_19 = arith.constant 0 : index
    %c0_20 = arith.constant 0 : index
    %32 = vector.load %arg8[%c2, %c0_19, %c0_20] : memref<9x1x256xf32, #tpu.memory_space<vmem>>, vector<1x1x256xf32>
    %33 = vector.shape_cast %32 : vector<1x1x256xf32> to vector<1x256xf32>
    %34 = vector.broadcast %33 : vector<1x256xf32> to vector<32x256xf32>
    %35 = arith.mulf %34, %31 : vector<32x256xf32>
    %c2_21 = arith.constant 2 : index
    %c0_22 = arith.constant 0 : index
    %c0_23 = arith.constant 0 : index
    %36 = vector.load %arg4[%c2_21, %c0_22, %c0_23] : memref<9x32x1xf32, #tpu.memory_space<vmem>>, vector<1x32x1xf32>
    %37 = vector.shape_cast %36 : vector<1x32x1xf32> to vector<32x1xf32>
    %38 = vector.broadcast %37 : vector<32x1xf32> to vector<32x256xf32>
    %39 = arith.mulf %38, %35 : vector<32x256xf32>
    %40 = arith.addf %30, %39 : vector<32x256xf32>
    %c1_i32 = arith.constant 1 : i32
    %41 = tpu.dynamic_rotate %9 by %c1_i32 dim 1 : vector<32x256xf32>, i32 -> vector<32x256xf32>
    %c3 = arith.constant 3 : index
    %c0_24 = arith.constant 0 : index
    %c0_25 = arith.constant 0 : index
    %42 = vector.load %arg8[%c3, %c0_24, %c0_25] : memref<9x1x256xf32, #tpu.memory_space<vmem>>, vector<1x1x256xf32>
    %43 = vector.shape_cast %42 : vector<1x1x256xf32> to vector<1x256xf32>
    %44 = vector.broadcast %43 : vector<1x256xf32> to vector<32x256xf32>
    %45 = arith.mulf %44, %41 : vector<32x256xf32>
    %c3_26 = arith.constant 3 : index
    %c0_27 = arith.constant 0 : index
    %c0_28 = arith.constant 0 : index
    %46 = vector.load %arg4[%c3_26, %c0_27, %c0_28] : memref<9x32x1xf32, #tpu.memory_space<vmem>>, vector<1x32x1xf32>
    %47 = vector.shape_cast %46 : vector<1x32x1xf32> to vector<32x1xf32>
    %48 = vector.broadcast %47 : vector<32x1xf32> to vector<32x256xf32>
    %49 = arith.mulf %48, %45 : vector<32x256xf32>
    %50 = arith.addf %40, %49 : vector<32x256xf32>
    %c4 = arith.constant 4 : index
    %c0_29 = arith.constant 0 : index
    %c0_30 = arith.constant 0 : index
    %51 = vector.load %arg4[%c4, %c0_29, %c0_30] : memref<9x32x1xf32, #tpu.memory_space<vmem>>, vector<1x32x1xf32>
    %52 = vector.shape_cast %51 : vector<1x32x1xf32> to vector<32x1xf32>
    %53 = vector.broadcast %52 : vector<32x1xf32> to vector<32x256xf32>
    %54 = arith.mulf %53, %9 : vector<32x256xf32>
    %55 = arith.addf %50, %54 : vector<32x256xf32>
    %c255_i32 = arith.constant 255 : i32
    %56 = tpu.dynamic_rotate %9 by %c255_i32 dim 1 : vector<32x256xf32>, i32 -> vector<32x256xf32>
    %c5 = arith.constant 5 : index
    %c0_31 = arith.constant 0 : index
    %c0_32 = arith.constant 0 : index
    %57 = vector.load %arg8[%c5, %c0_31, %c0_32] : memref<9x1x256xf32, #tpu.memory_space<vmem>>, vector<1x1x256xf32>
    %58 = vector.shape_cast %57 : vector<1x1x256xf32> to vector<1x256xf32>
    %59 = vector.broadcast %58 : vector<1x256xf32> to vector<32x256xf32>
    %60 = arith.mulf %59, %56 : vector<32x256xf32>
    %c5_33 = arith.constant 5 : index
    %c0_34 = arith.constant 0 : index
    %c0_35 = arith.constant 0 : index
    %61 = vector.load %arg4[%c5_33, %c0_34, %c0_35] : memref<9x32x1xf32, #tpu.memory_space<vmem>>, vector<1x32x1xf32>
    %62 = vector.shape_cast %61 : vector<1x32x1xf32> to vector<32x1xf32>
    %63 = vector.broadcast %62 : vector<32x1xf32> to vector<32x256xf32>
    %64 = arith.mulf %63, %60 : vector<32x256xf32>
    %65 = arith.addf %55, %64 : vector<32x256xf32>
    %c241_i32 = arith.constant 241 : i32
    %66 = tpu.dynamic_rotate %9 by %c241_i32 dim 1 : vector<32x256xf32>, i32 -> vector<32x256xf32>
    %c6 = arith.constant 6 : index
    %c0_36 = arith.constant 0 : index
    %c0_37 = arith.constant 0 : index
    %67 = vector.load %arg8[%c6, %c0_36, %c0_37] : memref<9x1x256xf32, #tpu.memory_space<vmem>>, vector<1x1x256xf32>
    %68 = vector.shape_cast %67 : vector<1x1x256xf32> to vector<1x256xf32>
    %69 = vector.broadcast %68 : vector<1x256xf32> to vector<32x256xf32>
    %70 = arith.mulf %69, %66 : vector<32x256xf32>
    %c6_38 = arith.constant 6 : index
    %c0_39 = arith.constant 0 : index
    %c0_40 = arith.constant 0 : index
    %71 = vector.load %arg4[%c6_38, %c0_39, %c0_40] : memref<9x32x1xf32, #tpu.memory_space<vmem>>, vector<1x32x1xf32>
    %72 = vector.shape_cast %71 : vector<1x32x1xf32> to vector<32x1xf32>
    %73 = vector.broadcast %72 : vector<32x1xf32> to vector<32x256xf32>
    %74 = arith.mulf %73, %70 : vector<32x256xf32>
    %75 = arith.addf %65, %74 : vector<32x256xf32>
    %c240_i32 = arith.constant 240 : i32
    %76 = tpu.dynamic_rotate %9 by %c240_i32 dim 1 : vector<32x256xf32>, i32 -> vector<32x256xf32>
    %c7 = arith.constant 7 : index
    %c0_41 = arith.constant 0 : index
    %c0_42 = arith.constant 0 : index
    %77 = vector.load %arg8[%c7, %c0_41, %c0_42] : memref<9x1x256xf32, #tpu.memory_space<vmem>>, vector<1x1x256xf32>
    %78 = vector.shape_cast %77 : vector<1x1x256xf32> to vector<1x256xf32>
    %79 = vector.broadcast %78 : vector<1x256xf32> to vector<32x256xf32>
    %80 = arith.mulf %79, %76 : vector<32x256xf32>
    %c7_43 = arith.constant 7 : index
    %c0_44 = arith.constant 0 : index
    %c0_45 = arith.constant 0 : index
    %81 = vector.load %arg4[%c7_43, %c0_44, %c0_45] : memref<9x32x1xf32, #tpu.memory_space<vmem>>, vector<1x32x1xf32>
    %82 = vector.shape_cast %81 : vector<1x32x1xf32> to vector<32x1xf32>
    %83 = vector.broadcast %82 : vector<32x1xf32> to vector<32x256xf32>
    %84 = arith.mulf %83, %80 : vector<32x256xf32>
    %85 = arith.addf %75, %84 : vector<32x256xf32>
    %c239_i32 = arith.constant 239 : i32
    %86 = tpu.dynamic_rotate %9 by %c239_i32 dim 1 : vector<32x256xf32>, i32 -> vector<32x256xf32>
    %c8 = arith.constant 8 : index
    %c0_46 = arith.constant 0 : index
    %c0_47 = arith.constant 0 : index
    %87 = vector.load %arg8[%c8, %c0_46, %c0_47] : memref<9x1x256xf32, #tpu.memory_space<vmem>>, vector<1x1x256xf32>
    %88 = vector.shape_cast %87 : vector<1x1x256xf32> to vector<1x256xf32>
    %89 = vector.broadcast %88 : vector<1x256xf32> to vector<32x256xf32>
    %90 = arith.mulf %89, %86 : vector<32x256xf32>
    %c8_48 = arith.constant 8 : index
    %c0_49 = arith.constant 0 : index
    %c0_50 = arith.constant 0 : index
    %91 = vector.load %arg4[%c8_48, %c0_49, %c0_50] : memref<9x32x1xf32, #tpu.memory_space<vmem>>, vector<1x32x1xf32>
    %92 = vector.shape_cast %91 : vector<1x32x1xf32> to vector<32x1xf32>
    %93 = vector.broadcast %92 : vector<32x1xf32> to vector<32x256xf32>
    %94 = arith.mulf %93, %90 : vector<32x256xf32>
    %95 = arith.addf %85, %94 : vector<32x256xf32>
    %c0_51 = arith.constant 0 : index
    %c0_52 = arith.constant 0 : index
    %96 = vector.load %arg5[%c0_51, %c0_52] : memref<32x1xf32, #tpu.memory_space<vmem>>, vector<32x1xf32>
    %97 = vector.broadcast %96 : vector<32x1xf32> to vector<32x256xf32>
    %98 = arith.addf %95, %97 : vector<32x256xf32>
    %cst_53 = arith.constant 0.000000e+00 : f32
    %99 = vector.broadcast %cst_53 : f32 to vector<32x256xf32>
    %100 = arith.maximumf %98, %99 : vector<32x256xf32>
    %c0_54 = arith.constant 0 : index
    %c0_55 = arith.constant 0 : index
    %101 = vector.load %arg6[%c0_54, %c0_55] : memref<32x32xbf16, #tpu.memory_space<vmem>>, vector<32x32xbf16>
    %102 = arith.truncf %100 : vector<32x256xf32> to vector<32x256xbf16>
    %cst_56 = arith.constant dense<0.000000e+00> : vector<32x256xf32>
    %103 = tpu.matmul %101, %102, %cst_56 {dimension_numbers = #tpu.dot_dimension_numbers<[1], [0], [0], [1], [0, 0, 1, 1], [], []>} : vector<32x32xbf16>, vector<32x256xbf16>, vector<32x256xf32> -> vector<32x256xf32>
    %c0_57 = arith.constant 0 : index
    %c0_58 = arith.constant 0 : index
    %104 = vector.load %arg7[%c0_57, %c0_58] : memref<32x1xf32, #tpu.memory_space<vmem>>, vector<32x1xf32>
    %105 = vector.broadcast %104 : vector<32x1xf32> to vector<32x256xf32>
    %106 = arith.addf %103, %105 : vector<32x256xf32>
    %107 = arith.addf %106, %1 : vector<32x256xf32>
    %cst_59 = arith.constant 0.000000e+00 : f32
    %108 = vector.broadcast %cst_59 : f32 to vector<32x256xf32>
    %109 = arith.maximumf %107, %108 : vector<32x256xf32>
    %c0_60 = arith.constant 0 : index
    %c0_61 = arith.constant 0 : index
    %c0_62 = arith.constant 0 : index
    %110 = vector.load %arg9[%c0_60, %c0_61, %c0_62] : memref<1x32x256xf32, #tpu.memory_space<vmem>>, vector<1x32x256xf32>
    %111 = vector.shape_cast %110 : vector<1x32x256xf32> to vector<32x256xf32>
    %112 = vector.shape_cast %109 : vector<32x256xf32> to vector<1x32x256xf32>
    tpu.vector_store %arg9[%c0_60, %c0_61, %c0_62], %112 {strides = array<i32>} : memref<1x32x256xf32, #tpu.memory_space<vmem>>, vector<1x32x256xf32>,
    return
  }
  func.func @transform_0(%arg0: i32) -> (i32, i32, i32) {
    %c0_i32 = arith.constant 0 : i32
    %c0_i32_0 = arith.constant 0 : i32
    %c0_i32_1 = arith.constant 0 : i32
    return %arg0, %c0_i32, %c0_i32_0 : i32, i32, i32
  }
  func.func @transform_1(%arg0: i32) -> (i32, i32) {
    %c0_i32 = arith.constant 0 : i32
    %c0_i32_0 = arith.constant 0 : i32
    %c0_i32_1 = arith.constant 0 : i32
    return %c0_i32, %c0_i32_0 : i32, i32
  }
  func.func @transform_2(%arg0: i32) -> (i32, i32) {
    %c0_i32 = arith.constant 0 : i32
    %c0_i32_0 = arith.constant 0 : i32
    %c0_i32_1 = arith.constant 0 : i32
    return %c0_i32, %c0_i32_0 : i32, i32
  }
  func.func @transform_3(%arg0: i32) -> (i32, i32, i32) {
    %c0_i32 = arith.constant 0 : i32
    %c0_i32_0 = arith.constant 0 : i32
    %c0_i32_1 = arith.constant 0 : i32
    %c0_i32_2 = arith.constant 0 : i32
    return %c0_i32, %c0_i32_0, %c0_i32_1 : i32, i32, i32
  }
  func.func @transform_4(%arg0: i32) -> (i32, i32) {
    %c0_i32 = arith.constant 0 : i32
    %c0_i32_0 = arith.constant 0 : i32
    %c0_i32_1 = arith.constant 0 : i32
    return %c0_i32, %c0_i32_0 : i32, i32
  }
  func.func @transform_5(%arg0: i32) -> (i32, i32) {
    %c0_i32 = arith.constant 0 : i32
    %c0_i32_0 = arith.constant 0 : i32
    %c0_i32_1 = arith.constant 0 : i32
    return %c0_i32, %c0_i32_0 : i32, i32
  }
  func.func @transform_6(%arg0: i32) -> (i32, i32) {
    %c0_i32 = arith.constant 0 : i32
    %c0_i32_0 = arith.constant 0 : i32
    %c0_i32_1 = arith.constant 0 : i32
    return %c0_i32, %c0_i32_0 : i32, i32
  }
  func.func @transform_7(%arg0: i32) -> (i32, i32, i32) {
    %c0_i32 = arith.constant 0 : i32
    %c0_i32_0 = arith.constant 0 : i32
    %c0_i32_1 = arith.constant 0 : i32
    %c0_i32_2 = arith.constant 0 : i32
    return %c0_i32, %c0_i32_0, %c0_i32_1 : i32, i32, i32
  }
  func.func @transform_8(%arg0: i32) -> (i32, i32, i32) {
    %c0_i32 = arith.constant 0 : i32
    %c0_i32_0 = arith.constant 0 : i32
    %c0_i32_1 = arith.constant 0 : i32
    return %arg0, %c0_i32, %c0_i32_0 : i32, i32, i32
  }
}

</mosaic_0001>

<bundles_post_ra>
// kernel: tpu_custom_call.1
= control target key start
LH: loop header
LB: loop body
LE: loop exit
PB: predicated region body
PF: predicated region fallthrough
CT: control target
= control target key end

     0   :  { %13 = vsyncpa [#allocation3], 0  ;;  %s2414_s0 = inlined_call_operand.vmem [shape: f32[2,32,256], index: 0, kind: input, shape index: {}]   ;;  %s2415_s1 = inlined_call_operand.vmem [shape: bf16[32,32], index: 1, kind: input, shape index: {}]   ;;  %s2416_s2 = inlined_call_operand.vmem [shape: f32[32,1], index: 2, kind: input, shape index: {}]   ;;  %s2417_s3 = inlined_call_operand.vmem [shape: f32[9,32,1], index: 3, kind: input, shape index: {}]   ;;  %s2418_s4 = inlined_call_operand.vmem [shape: f32[32,1], index: 4, kind: input, shape index: {}]   ;;  %s2419_s5 = inlined_call_operand.vmem [shape: bf16[32,32], index: 5, kind: input, shape index: {}]   ;;  %s2420_s6 = inlined_call_operand.vmem [shape: f32[32,1], index: 6, kind: input, shape index: {}]   ;;  %s2421_s7 = inlined_call_operand.vmem [shape: f32[9,1,256], index: 7, kind: input, shape index: {}]   ;;  %s2422_s8 = inlined_call_operand.hbm [shape: f32[2,32,256], index: 8, kind: output, shape index: {}]  }
   0x1   :  { %15 = vsyncpa [#allocation3 + $0x1], 0  ;;  %s1585_s27 = smov 0   ;;  %s1587_s28 = smov 0  }
   0x2   :  { %s1589_s29 = smov 0   ;;  %s1591_s30 = smov 0  }
   0x3 LB: > { %s1606_s9 = sadd.s32 4294967295, %s1528_s30   ;;  %s1325_s10 = sadd.s32 4294967294, %s1528_s30   ;;  %s1528_s30 = sphi %s1591_s30, %s2428_s30   ;;  %s1524_s29 = sphi %s1589_s29, %s2427_s29   ;;  %s1520_s28 = sphi %s1587_s28, %s2426_s28   ;;  %s1516_s27 = sphi %s1585_s27, %s2425_s27  }
   0x4   : > { %s1610_s11 = sadd.s32 1, %s1528_s30   ;;  %s201_s12 = sadd.s32 1, %s1524_s29 }
   0x5   : > { %s198_s13 = ssub.s32 %s1528_s30, %s1610_s11  ;;  %p211_p0 = scmp.ne.s32.totalorder %s1524_s29, %s1520_s28 }
   0x6   : > { %p199_p1 = scmp.eq.s32.totalorder %s198_s13, 0  ;;  %p212_p2 = scmp.eq.s32.totalorder %s1606_s9, 1 }
   0x7   : > { %p217_p3 = scmp.ne.s32.totalorder %s1520_s28, %s1516_s27  ;;  %p218_p4 = scmp.eq.s32.totalorder %s1325_s10, 1 }
   0x8   : > { %s1621_s14 = scalar_select %p199_p1, %s1524_s29, %s201_s12  }
   0x9   : > { %p1623_p5 = por %p212_p2, %p211_p0  ;;  %p1627_p6 = por %p218_p4, %p217_p3 }
   0xa   : > { %p1328_p7 = scmp.ge.s32.totalorder %s1528_s30, 1  ;;  %p265_p8 = scmp.lt.s32.totalorder %s1528_s30, 3 }
   0xc   : > { %p266_p9 = pnand %p1328_p7, %p265_p8 }
   0xd   : > { %p299_p10 = scmp.lt.s32.totalorder (!%p266_p9), %s1606_s9, 1  ;;  %s1531_s25 = smov (!%p266_p9), 16  }
   0xe   : > { %269 = sbr.rel (%p266_p9) target bundleno = 670 (0x29e), region = 52  ;;  %s1532_s26 = smov (!%p266_p9), 17  }
   0xf   : > { %s1533_s12 = smov (!%p266_p9), 15   ;;  %s1534_s13 = smov (!%p266_p9), 1  }
  0x10   : > { %s1535_s17 = smov (!%p266_p9), 127   ;;  %s1536_s18 = smov (!%p266_p9), 113  }
  0x11   : > { %s296_s20 = sand.u32 (!%p266_p9), 1, %s1520_s28   ;;  %s1405_s22 = sshll.u32 (!%p266_p9), %s1606_s9, 6 }
  0x12   : > { %s1248_s19 = scalar_lea.sflag (!%p266_p9), [#allocation3], %s296_s20 }
  0x13   : > { %v323_v0 = vld [vmem:[%s2416_s2 + $0x10] sm:$0xff]  ;;  %v321_v1 = vld [vmem:[%s2416_s2] sm:$0xff]  ;;  %v1530_v2 = vmov 0   ;;  %s300_s21 = scalar_select %p299_p10, %s1606_s9, 1  ;;  %v324_v4 = vld [vmem:[%s2416_s2 + $0x18] sm:$0xff]  ;;  %vm355_vm0 = vcmask 261120  }
  0x14   : > { %1456 = vset.pattern.permute.xlu1 %v1530_v2  ;;  %1455 = vset.pattern.permute.xlu0 %v1530_v2  ;;  %v451_v3 = vld [vmem:[%s2417_s3 + $0x10] sm:$0xff]  ;;  %v322_v13 = vld [vmem:[%s2416_s2 + $0x8] sm:$0xff]  ;;  %v1401_v19 = vld [vmem:[%s2415_s1] sm:$0xff] }
  0x15   : > { %337 = vperm.xlu1 %1456, %v323_v0   ;;  %327 = vperm.xlu0 %1455, %v321_v1   ;;  %s1400_s24 = sshll.u32 %s300_s21, 6  ;;  %v1347_v17 = vld [vmem:[%s2417_s3 + $0x30] sm:$0xff]  ;;  %v450_v20 = vld [vmem:[%s2417_s3 + $0x8] sm:$0xff]  ;;  %v449_v21 = vld [vmem:[%s2417_s3] sm:$0xff]  ;;  %s1329_s21 = sshll.u32 %s296_s20, 6 }
  0x16   : > { %1457 = vset.pattern.permute.xlu2 %v1530_v2  ;;  %s1647_s10 = scalar_lea.vmem %s2414_s0, %s1400_s24  ;;  %v1352_v22 = vld [vmem:[%s2417_s3 + $0x50] sm:$0xff]  ;;  %v1346_v23 = vld [vmem:[%s2417_s3 + $0x28] sm:$0xff]  ;;  %v452_v24 = vld [vmem:[%s2417_s3 + $0x18] sm:$0xff]  ;;  %s1259_s24 = scalar_lea.hbm %s2422_s8, %s1405_s22 }
  0x17   : > { %465 = vperm.xlu2 %1457, %v451_v3   ;;  %v309_v5 = vld [vmem:[%s1647_s10 + $0x20] sm:$0xff]  ;;  %v311_v6 = vld [vmem:[%s1647_s10 + $0x30] sm:$0xff]  ;;  %v310_v7 = vld [vmem:[%s1647_s10 + $0x28] sm:$0xff]  ;;  %s1262_s9 = sshll.u32 %s1259_s24, 4  ;;  %s1263_s9 = int_to_ptr.hbm [resolvable:$true] %s1262_s9 }
  0x18   : > { %v319_v8 = vpack.c.bf16 %v311_v6, %v309_v5  ;;  %v312_v9 = vld [vmem:[%s1647_s10 + $0x38] sm:$0xff]  ;;  %v305_v10 = vld [vmem:[%s1647_s10] sm:$0xff]  ;;  %v307_v11 = vld [vmem:[%s1647_s10 + $0x10] sm:$0xff] }
  0x19   : > { %v320_v12 = vpack.c.bf16 %v312_v9, %v310_v7  ;;  %v306_v14 = vld [vmem:[%s1647_s10 + $0x8] sm:$0xff]  ;;  %v308_v15 = vld [vmem:[%s1647_s10 + $0x18] sm:$0xff]  ;;  %v317_v16 = vpack.c.bf16 %v307_v11, %v305_v10  ;;  %v1357_v25 = vld [vmem:[%s2417_s3 + $0x70] sm:$0xff] }
  0x1a   : > { %368 = vmatpush.bf16.msra.mxu0 %v319_v8  ;;  %v318_v18 = vpack.c.bf16 %v308_v15, %v306_v14  ;;  %v1402_v26 = vld [vmem:[%s2415_s1 + $0x8] sm:$0xff]  ;;  %v1345_v28 = vld [vmem:[%s2417_s3 + $0x20] sm:$0xff]  ;;  %v1348_v31 = vld [vmem:[%s2417_s3 + $0x38] sm:$0xff] }
  0x1b   : > { %387 = vmatpush.bf16.msra.mxu1 %v320_v12  ;;  %v1351_v27 = vld [vmem:[%s2417_s3 + $0x48] sm:$0xff]  ;;  %v1359_v32 = vld [vmem:[%s2417_s3 + $0x80] sm:$0xff]  ;;  %v1362_v34 = vld [vmem:[%s2417_s3 + $0x98] sm:$0xff] }
  0x1c   : > { %v1360_v29 = vld [vmem:[%s2417_s3 + $0x88] sm:$0xff]  ;;  %v1350_v33 = vld [vmem:[%s2417_s3 + $0x40] sm:$0xff]  ;;  %v1353_v35 = vld [vmem:[%s2417_s3 + $0x58] sm:$0xff] }
  0x1d   : > { %342 = vperm.xlu1 %1456, %v324_v4   ;;  %332 = vperm.xlu0 %1455, %v322_v13   ;;  %v1356_v30 = vld [vmem:[%s2417_s3 + $0x68] sm:$0xff]  ;;  %v1355_v36 = vld [vmem:[%s2417_s3 + $0x60] sm:$0xff]  ;;  %v1358_v37 = vld [vmem:[%s2417_s3 + $0x78] sm:$0xff] }
  0x1e   : > { %369 = vmatpush.bf16.msra.mxu0 %v317_v16  ;;  %v1361_v38 = vld [vmem:[%s2417_s3 + $0x90] sm:$0xff] }
  0x1f   : > { %546 = vperm.xlu2 %1457, %v1347_v17   ;;  %388 = vmatpush.bf16.msra.mxu1 %v318_v18  ;;  %v424_v18 = vlaneseq }
  0x21   : > { %1340 = vmatmul.msk.bf16.vlgmr.msra.gmra.mxu0 %vm355_vm0, %v1401_v19 }
  0x22   : > { %1342 = vmatmul.msk.bf16.vlgmr.msra.gmra.mxu1 %vm355_vm0, %v1401_v19 }
  0x25   : > { %460 = vperm.xlu1 %1456, %v450_v20   ;;  %455 = vperm.xlu0 %1455, %v449_v21   ;;  %v1846_v20 = vand.u32 127, %v424_v18  ;;  %v1366_v21 = vld [vmem:[%s2417_s3 + $0xb0] sm:$0xff] }
  0x27   : > { %627 = vperm.xlu2 %1457, %v1352_v22   ;;  %vm426_vm1 = vcmp.lt.s32.totalorder %v1846_v20, 17  ;;  %vm505_vm2 = vcmp.lt.s32.totalorder %v1846_v20, 16  ;;  %vm586_vm3 = vcmp.lt.s32.totalorder %v1846_v20, 15  ;;  %vm667_vm4 = vcmp.lt.s32.totalorder %v1846_v20, 1 }
  0x28   : > { %vm870_vm5 = vcmp.lt.s32.totalorder %v1846_v20, 113  ;;  %vm789_vm6 = vcmp.lt.s32.totalorder %v1846_v20, 127  ;;  %vm951_vm7 = vcmp.lt.s32.totalorder %v1846_v20, 112  ;;  %vm1032_vm8 = vcmp.lt.s32.totalorder %v1846_v20, 111 }
  0x2d   : > { %541 = vperm.xlu1 %1456, %v1346_v23   ;;  %470 = vperm.xlu0 %1455, %v452_v24  }
  0x2f   : > { %708 = vperm.xlu2 %1457, %v1357_v25  }
  0x31   : > { %1341 = vmatmul.msk.bf16.gmra.mxu0 %vm355_vm0, %v1402_v26 }
  0x32   : > { %1343 = vmatmul.msk.bf16.gmra.mxu1 %vm355_vm0, %v1402_v26 }
  0x35   : > { %622 = vperm.xlu1 %1456, %v1351_v27   ;;  %536 = vperm.xlu0 %1455, %v1345_v28  }
  0x37   : > { %744 = vperm.xlu2 %1457, %v1360_v29  }
  0x3d   : > { %703 = vperm.xlu1 %1456, %v1356_v30   ;;  %551 = vperm.xlu0 %1455, %v1348_v31   ;;  %v435_v30 = vld [vmem:[%s2421_s7] sm:$0x3]  ;;  %v1367_v31 = vld [vmem:[%s2417_s3 + $0xb8] sm:$0xff] }
  0x45   : > { %739 = vperm.xlu1 %1456, %v1359_v32   ;;  %617 = vperm.xlu0 %1455, %v1350_v33   ;;  %v1344_v32 = vld [vmem:[%s2421_s7 + $0x2] sm:$0x3]  ;;  %v1883_v33 = vperm.slane %v435_v30, 0 }
  0x4d   : > { %754 = vperm.xlu1 %1456, %v1362_v34   ;;  %632 = vperm.xlu0 %1455, %v1353_v35   ;;  %v1885_v34 = vperm.slane %v435_v30, 1  ;;  %v1890_v35 = vperm.slane %v1344_v32, 0 }
  0x55   : > { %698 = vperm.xlu0 %1455, %v1355_v36   ;;  %v1892_v36 = vperm.slane %v1344_v32, 1 }
  0x5d   : > { %713 = vperm.xlu0 %1455, %v1358_v37  }
  0x65   : > { %749 = vperm.xlu0 %1455, %v1361_v38  }
  0x71   : > { %v1776_v58 = vpop.permute.xlu2 %465 }
  0x79   : > { %v1788_v0 = vpop.permute.xlu2 %546 }
  0x81   : > { %v1800_v3 = vpop.permute.xlu2 %627 }
  0x87   : > { %v328_v39 = vpop.permute.xlu0 %327  ;;  %v338_v50 = vpop.permute.xlu1 %337 }
  0x89   : > { %v1814_v9 = vpop.permute.xlu2 %708 }
  0x8f   : > { %v333_v45 = vpop.permute.xlu0 %332  ;;  %v343_v62 = vpop.permute.xlu1 %342 }
  0x91   : > { %v1832_v13 = vpop.permute.xlu2 %744 }
  0x97   : > { %v1766_v55 = vpop.permute.xlu0 %455  ;;  %v1792_v2 = vpop.permute.xlu1 %460 }
  0x9e   : > { %v371_v40 = vpop.f32.mrf.mxu0 }
  0x9f   : > { %v372_v41 = vadd.f32 %v371_v40, %v328_v39  ;;  %v390_v42 = vpop.f32.mrf.mxu1  ;;  %v1778_v61 = vpop.permute.xlu0 %470 }
  0xa0   : > { %v391_v44 = vadd.f32 %v390_v42, %v328_v39  ;;  %v1810_v6 = vpop.permute.xlu1 %541 }
  0xa1   : > { %v1730_v43 = vmax.f32 %v372_v41, 0.0 }
  0xa2   : > { %v1736_v48 = vmax.f32 %v391_v44, 0.0 }
  0xa3   : > { %489 = vrot.lane.b32.xlu1 %v1730_v43, %s1531_s25  ;;  %408 = vrot.lane.b32.xlu2 %v1730_v43, %s1532_s26 }
  0xa6   : > { %v373_v54 = vpop.f32.mrf.mxu0 }
  0xa7   : > { %v392_v46 = vpop.f32.mrf.mxu1  ;;  %v374_v56 = vadd.f32 %v373_v54, %v333_v45  ;;  %v1790_v1 = vpop.permute.xlu0 %536 }
  0xa8   : > { %v393_v47 = vadd.f32 %v392_v46, %v333_v45  ;;  %v1824_v11 = vpop.permute.xlu1 %622 }
  0xa9   : > { %v1768_v57 = vmax.f32 %v374_v56, 0.0  ;;  %v1372_v56 = vld [vmem:[%s2417_s3 + $0xd8] sm:$0xff] }
  0xaa   : > { %v1738_v49 = vmax.f32 %v393_v47, 0.0  ;;  %v1349_v47 = vld [vmem:[%s2421_s7 + $0x4] sm:$0x3] }
  0xab   : > { %570 = vrot.lane.b32.xlu1 %v1730_v43, %s1533_s12  ;;  %416 = vrot.lane.b32.xlu2 %v1736_v48, %s1532_s26 }
  0xac   : > { %418 = vrot.lane.b32.xlu0 %v1738_v49, %s1532_s26 }
  0xae   : > { %v376_v59 = vpop.f32.mrf.mxu0 }
  0xaf   : > { %v395_v51 = vpop.f32.mrf.mxu1  ;;  %v377_v60 = vadd.f32 %v376_v59, %v338_v50  ;;  %v1806_v5 = vpop.permute.xlu0 %551 }
  0xb0   : > { %v396_v52 = vadd.f32 %v395_v51, %v338_v50  ;;  %v1836_v16 = vpop.permute.xlu1 %703 }
  0xb1   : > { %v1780_v63 = vmax.f32 %v377_v60, 0.0 }
  0xb2   : > { %v1752_v53 = vmax.f32 %v396_v52, 0.0 }
  0xb3   : > { %651 = vrot.lane.b32.xlu1 %v1730_v43, %s1534_s13  ;;  %497 = vrot.lane.b32.xlu2 %v1736_v48, %s1531_s25 }
  0xb4   : > { %499 = vrot.lane.b32.xlu0 %v1738_v49, %s1531_s25 }
  0xb6   : > { %v378_v4 = vpop.f32.mrf.mxu0 }
  0xb7   : > { %v379_v7 = vadd.f32 %v378_v4, %v343_v62  ;;  %v1822_v10 = vpop.permute.xlu0 %617  ;;  %v397_v12 = vpop.f32.mrf.mxu1 }
  0xb8   : > { %v398_v14 = vadd.f32 %v397_v12, %v343_v62  ;;  %v1853_v23 = vpop.permute.xlu1 %739  ;;  %v1921_v62 = vperm.slane %v1349_v47, 0 }
  0xb9   : > { %v1812_v8 = vmax.f32 %v379_v7, 0.0 }
  0xba   : > { %v1838_v17 = vmax.f32 %v398_v14, 0.0 }
  0xbb   : > { %420 = vrot.lane.b32.xlu1 %v1752_v53, %s1532_s26  ;;  %578 = vrot.lane.b32.xlu2 %v1736_v48, %s1533_s12 }
  0xbc   : > { %580 = vrot.lane.b32.xlu0 %v1738_v49, %s1533_s12 }
  0xbf   : > { %v1834_v15 = vpop.permute.xlu0 %632 }
  0xc0   : > { %v1872_v28 = vpop.permute.xlu1 %754 }
  0xc3   : > { %501 = vrot.lane.b32.xlu1 %v1752_v53, %s1531_s25  ;;  %659 = vrot.lane.b32.xlu2 %v1736_v48, %s1534_s13 }
  0xc4   : > { %661 = vrot.lane.b32.xlu0 %v1738_v49, %s1534_s13 }
  0xc7   : > { %v1851_v22 = vpop.permute.xlu0 %698 }
  0xcb   : > { %582 = vrot.lane.b32.xlu1 %v1752_v53, %s1533_s12  ;;  %773 = vrot.lane.b32.xlu2 %v1730_v43, %s1535_s17 }
  0xcc   : > { %775 = vrot.lane.b32.xlu0 %v1768_v57, %s1535_s17 }
  0xcf   : > { %v1868_v27 = vpop.permute.xlu0 %713 }
  0xd3   : > { %663 = vrot.lane.b32.xlu1 %v1752_v53, %s1534_s13  ;;  %410 = vrot.lane.b32.xlu2 %v1768_v57, %s1532_s26 }
  0xd4   : > { %412 = vrot.lane.b32.xlu0 %v1780_v63, %s1532_s26 }
  0xd7   : > { %v1898_v41 = vpop.permute.xlu0 %749 }
  0xdb   : > { %777 = vrot.lane.b32.xlu1 %v1780_v63, %s1535_s17  ;;  %491 = vrot.lane.b32.xlu2 %v1768_v57, %s1531_s25 }
  0xdc   : > { %493 = vrot.lane.b32.xlu0 %v1780_v63, %s1531_s25 }
  0xe3   : > { %866 = vrot.lane.b32.xlu1 %v1752_v53, %s1536_s18  ;;  %572 = vrot.lane.b32.xlu2 %v1768_v57, %s1533_s12 }
  0xe4   : > { %574 = vrot.lane.b32.xlu0 %v1780_v63, %s1533_s12 }
  0xeb   : > { %414 = vrot.lane.b32.xlu1 %v1812_v8, %s1532_s26  ;;  %653 = vrot.lane.b32.xlu2 %v1768_v57, %s1534_s13 }
  0xec   : > { %655 = vrot.lane.b32.xlu0 %v1780_v63, %s1534_s13 }
  0xf3   : > { %495 = vrot.lane.b32.xlu1 %v1812_v8, %s1531_s25  ;;  %858 = vrot.lane.b32.xlu2 %v1780_v63, %s1536_s18 }
  0xf4   : > { %785 = vrot.lane.b32.xlu0 %v1752_v53, %s1535_s17 }
  0xfb   : > { %576 = vrot.lane.b32.xlu1 %v1812_v8, %s1533_s12  ;;  %422 = vrot.lane.b32.xlu2 %v1838_v17, %s1532_s26  ;;  %s1538_s26 = smov 111  }
  0xfc   : > { %860 = vrot.lane.b32.xlu0 %v1812_v8, %s1536_s18 }
  0xfd   : > { %v409_v19 = vpop.permute.xlu2 %408 }
 0x103   : > { %657 = vrot.lane.b32.xlu1 %v1812_v8, %s1534_s13  ;;  %503 = vrot.lane.b32.xlu2 %v1838_v17, %s1531_s25 }
 0x104   : > { %830 = vperm.xlu0 %1455, %v1366_v21   ;;  %v1354_v21 = vld [vmem:[%s2421_s7 + $0x6] sm:$0x3] }
 0x105   : > { %v417_v24 = vpop.permute.xlu2 %416  ;;  %v1941_v30 = vperm.slane %v1354_v21, 0 }
 0x106   : > { %v427_v25 = vsel %vm426_vm1, %v409_v19, %v417_v24  ;;  %v431_v26 = vsel %vm426_vm1, %v417_v24, %v409_v19 }
 0x107   : > { %v441_v37 = vmul.f32 %v1883_v33, %v431_v26  ;;  %v442_v38 = vmul.f32 %v1885_v34, %v427_v25 }
 0x109   : > { %v473_v50 = vmul.f32 %v1766_v55, %v441_v37  ;;  %v474_v51 = vmul.f32 %v1766_v55, %v442_v38  ;;  %v1923_v55 = vperm.slane %v1349_v47, 1  ;;  %v758_v47 = vmul.f32 %v1853_v23, %v1736_v48 }
 0x10b   : > { %787 = vrot.lane.b32.xlu1 %v1838_v17, %s1535_s17  ;;  %584 = vrot.lane.b32.xlu2 %v1838_v17, %s1533_s12  ;;  %s1537_s12 = smov 112  }
 0x10c   : > { %783 = vrot.lane.b32.xlu0 %v1738_v49, %s1535_s17 }
 0x10d   : > { %v498_v29 = vpop.permute.xlu2 %497 }
 0x113   : > { %835 = vperm.xlu1 %1456, %v1367_v31   ;;  %665 = vrot.lane.b32.xlu2 %v1838_v17, %s1534_s13  ;;  %v1943_v31 = vperm.slane %v1354_v21, 1  ;;  %s1480_s13 = sshra.s32 %s1263_s9, 4  ;;  %s1481_s13 = int_to_ptr.hbm [resolvable:$true] %s1480_s13 }
 0x114   : > { %947 = vrot.lane.b32.xlu0 %v1752_v53, %s1537_s12  ;;  %p1487_p0 = scmp.lt.s32.totalorder %s1481_s13, %s2422_s8 }
 0x115   : > { %v490_v39 = vpop.permute.xlu1 %489  ;;  %v579_v40 = vpop.permute.xlu2 %578 }
 0x116   : > { %v506_v42 = vsel %vm505_vm2, %v490_v39, %v498_v29  ;;  %v510_v44 = vsel %vm505_vm2, %v498_v29, %v490_v39 }
 0x117   : > { %v521_v45 = vmul.f32 %v1890_v35, %v510_v44  ;;  %v522_v46 = vmul.f32 %v1892_v36, %v506_v42 }
 0x119   : > { %v554_v52 = vmul.f32 %v1790_v1, %v521_v45  ;;  %v555_v54 = vmul.f32 %v1790_v1, %v522_v46  ;;  %v757_v46 = vmul.f32 %v1853_v23, %v1730_v43 }
 0x11b   : > { %v562_v59 = vadd.f32 %v554_v52, %v473_v50  ;;  %v563_v60 = vadd.f32 %v555_v54, %v474_v51  ;;  %939 = vrot.lane.b32.xlu1 %v1780_v63, %s1537_s12  ;;  %779 = vrot.lane.b32.xlu2 %v1812_v8, %s1535_s17 }
 0x11c   : > { %916 = vperm.xlu0 %1455, %v1372_v56  }
 0x11d   : > { %v571_v1 = vpop.permute.xlu1 %570  ;;  %v660_v4 = vpop.permute.xlu2 %659 }
 0x11e   : > { %v419_v7 = vpop.permute.xlu0 %418  ;;  %v587_v12 = vsel %vm586_vm3, %v571_v1, %v579_v40  ;;  %v591_v14 = vsel %vm586_vm3, %v579_v40, %v571_v1  ;;  %v1364_v1 = vld [vmem:[%s2417_s3 + $0xa0] sm:$0xff] }
 0x11f   : > { %v602_v18 = vmul.f32 %v1921_v62, %v591_v14  ;;  %v603_v19 = vmul.f32 %v1923_v55, %v587_v12 }
 0x121   : > { %v635_v24 = vmul.f32 %v1822_v10, %v602_v18  ;;  %v636_v25 = vmul.f32 %v1822_v10, %v603_v19 }
 0x123   : > { %v643_v26 = vadd.f32 %v635_v24, %v562_v59  ;;  %v644_v29 = vadd.f32 %v636_v25, %v563_v60  ;;  %949 = vrot.lane.b32.xlu1 %v1838_v17, %s1537_s12  ;;  %868 = vrot.lane.b32.xlu2 %v1838_v17, %s1536_s18 }
 0x124   : > { %862 = vrot.lane.b32.xlu0 %v1736_v48, %s1536_s18 }
 0x125   : > { %v652_v32 = vpop.permute.xlu1 %651  ;;  %v1947_v37 = vpop.permute.xlu2 %773 }
 0x126   : > { %v500_v10 = vpop.permute.xlu0 %499  ;;  %v668_v38 = vsel %vm667_vm4, %v652_v32, %v660_v4  ;;  %v672_v39 = vsel %vm667_vm4, %v660_v4, %v652_v32 }
 0x127   : > { %v683_v40 = vmul.f32 %v1941_v30, %v672_v39  ;;  %v684_v42 = vmul.f32 %v1943_v31, %v668_v38 }
 0x129   : > { %v716_v44 = vmul.f32 %v1851_v22, %v683_v40  ;;  %v717_v45 = vmul.f32 %v1851_v22, %v684_v42 }
 0x12b   : > { %v724_v50 = vadd.f32 %v716_v44, %v643_v26  ;;  %v725_v51 = vadd.f32 %v717_v45, %v644_v29  ;;  %854 = vrot.lane.b32.xlu1 %v1730_v43, %s1536_s18  ;;  %781 = vrot.lane.b32.xlu2 %v1736_v48, %s1535_s17  ;;  %v1371_v26 = vld [vmem:[%s2417_s3 + $0xd0] sm:$0xff]  ;;  %s1482_s17 = scalar_lea.hbm %s1481_s13, 64 }
 0x12c   : > { %1022 = vrot.lane.b32.xlu0 %v1812_v8, %s1538_s26  ;;  %p1483_p11 = scmp.ne.s32.totalorder %s1481_s13, %s1482_s17 }
 0x12d   : > { %v421_v52 = vpop.permute.xlu1 %420  ;;  %v411_v22 = vpop.permute.xlu2 %410  ;;  %v1967_v54 = vadd.f32 %v757_v46, %v724_v50  ;;  %v1969_v56 = vadd.f32 %v758_v47, %v725_v51  ;;  %v1365_v51 = vld [vmem:[%s2417_s3 + $0xa8] sm:$0xff] }
 0x12e   : > { %v581_v59 = vpop.permute.xlu0 %580  ;;  %v428_v23 = vsel %vm426_vm1, %v411_v22, %v419_v7  ;;  %v432_v60 = vsel %vm426_vm1, %v419_v7, %v411_v22  ;;  %p1484_p12 = pnand %p1483_p11, %p1623_p5 }
 0x12f   : > { %v443_v4 = vmul.f32 %v1883_v33, %v432_v60  ;;  %v444_v12 = vmul.f32 %v1885_v34, %v428_v23 }
 0x130   : > { %p1485_p13 = pneg %p1484_p12 }
 0x131   : > { %v475_v29 = vmul.f32 %v1792_v2, %v443_v4  ;;  %v476_v32 = vmul.f32 %v1792_v2, %v444_v12 }
 0x133   : > { %864 = vrot.lane.b32.xlu1 %v1738_v49, %s1536_s18  ;;  %941 = vrot.lane.b32.xlu2 %v1812_v8, %s1537_s12 }
 0x134   : > { %820 = vperm.xlu0 %1455, %v1364_v1  }
 0x135   : > { %v502_v14 = vpop.permute.xlu1 %501  ;;  %v492_v18 = vpop.permute.xlu2 %491 }
 0x136   : > { %v662_v19 = vpop.permute.xlu0 %661  ;;  %v507_v7 = vsel %vm505_vm2, %v492_v18, %v500_v10  ;;  %v511_v21 = vsel %vm505_vm2, %v500_v10, %v492_v18  ;;  %v1377_v10 = vld [vmem:[%s2417_s3 + $0xf8] sm:$0xff] }
 0x137   : > { %v523_v24 = vmul.f32 %v1890_v35, %v511_v21  ;;  %v524_v25 = vmul.f32 %v1892_v36, %v507_v7 }
 0x139   : > { %v556_v38 = vmul.f32 %v1810_v6, %v523_v24  ;;  %v557_v39 = vmul.f32 %v1810_v6, %v524_v25 }
 0x13b   : > { %v564_v40 = vadd.f32 %v556_v38, %v475_v29  ;;  %v565_v42 = vadd.f32 %v557_v39, %v476_v32  ;;  %1028 = vrot.lane.b32.xlu1 %v1752_v53, %s1538_s26  ;;  %911 = vperm.xlu2 %1457, %v1371_v26   ;;  %v1370_v32 = vld [vmem:[%s2417_s3 + $0xc8] sm:$0xff] }
 0x13c   : > { %997 = vperm.xlu0 %1455, %v1377_v10  }
 0x13d   : > { %v583_v44 = vpop.permute.xlu1 %582  ;;  %v573_v45 = vpop.permute.xlu2 %572 }
 0x13e   : > { %v2002_v46 = vpop.permute.xlu0 %775  ;;  %v588_v2 = vsel %vm586_vm3, %v573_v45, %v581_v59  ;;  %v592_v6 = vsel %vm586_vm3, %v581_v59, %v573_v45 }
 0x13f   : > { %v604_v47 = vmul.f32 %v1921_v62, %v592_v6  ;;  %v605_v50 = vmul.f32 %v1923_v55, %v588_v2 }
 0x141   : > { %v637_v22 = vmul.f32 %v1824_v11, %v604_v47  ;;  %v638_v23 = vmul.f32 %v1824_v11, %v605_v50 }
 0x143   : > { %v645_v60 = vadd.f32 %v637_v22, %v564_v40  ;;  %v646_v1 = vadd.f32 %v638_v23, %v565_v42  ;;  %825 = vperm.xlu1 %1456, %v1365_v51   ;;  %856 = vrot.lane.b32.xlu2 %v1768_v57, %s1536_s18 }
 0x144   : > { %943 = vrot.lane.b32.xlu0 %v1736_v48, %s1537_s12 }
 0x145   : > { %v664_v59 = vpop.permute.xlu1 %663  ;;  %v654_v4 = vpop.permute.xlu2 %653 }
 0x146   : > { %v413_v12 = vpop.permute.xlu0 %412  ;;  %v669_v18 = vsel %vm667_vm4, %v654_v4, %v662_v19  ;;  %v673_v7 = vsel %vm667_vm4, %v662_v19, %v654_v4 }
 0x147   : > { %v429_v11 = vsel %vm426_vm1, %v413_v12, %v421_v52  ;;  %v433_v21 = vsel %vm426_vm1, %v421_v52, %v413_v12  ;;  %v685_v24 = vmul.f32 %v1941_v30, %v673_v7  ;;  %v686_v25 = vmul.f32 %v1943_v31, %v669_v18 }
 0x148   : > { %v446_v10 = vmul.f32 %v1885_v34, %v429_v11  ;;  %v1381_v11 = vld [vmem:[%s2417_s3 + $0x110] sm:$0xff] }
 0x149   : > { %v718_v26 = vmul.f32 %v1836_v16, %v685_v24  ;;  %v719_v29 = vmul.f32 %v1836_v16, %v686_v25  ;;  %v445_v16 = vmul.f32 %v1883_v33, %v433_v21  ;;  %v1376_v21 = vld [vmem:[%s2417_s3 + $0xf0] sm:$0xff] }
 0x14a   : > { %v478_v50 = vmul.f32 %v1776_v58, %v446_v10 }
 0x14b   : > { %v2034_v38 = vadd.f32 %v718_v26, %v645_v60  ;;  %v2036_v19 = vadd.f32 %v719_v29, %v646_v1  ;;  %935 = vrot.lane.b32.xlu1 %v1730_v43, %s1537_s12  ;;  %1020 = vrot.lane.b32.xlu2 %v1780_v63, %s1538_s26  ;;  %v477_v47 = vmul.f32 %v1776_v58, %v445_v16 }
 0x14c   : > { %906 = vperm.xlu0 %1455, %v1370_v32  }
 0x14d   : > { %v2042_v52 = vpop.permute.xlu1 %777  ;;  %v859_v39 = vpop.permute.xlu2 %858 }
 0x14e   : > { %v494_v40 = vpop.permute.xlu0 %493 }
 0x14f   : > { %v508_v42 = vsel %vm505_vm2, %v494_v40, %v502_v14  ;;  %v512_v45 = vsel %vm505_vm2, %v502_v14, %v494_v40 }
 0x150   : > { %v525_v2 = vmul.f32 %v1890_v35, %v512_v45  ;;  %v526_v6 = vmul.f32 %v1892_v36, %v508_v42 }
 0x152   : > { %v558_v51 = vmul.f32 %v1788_v0, %v525_v2  ;;  %v559_v22 = vmul.f32 %v1788_v0, %v526_v6  ;;  %v1379_v2 = vld [vmem:[%s2417_s3 + $0x100] sm:$0xff] }
 0x153   : > { %945 = vrot.lane.b32.xlu1 %v1738_v49, %s1537_s12  ;;  %1030 = vrot.lane.b32.xlu2 %v1838_v17, %s1538_s26 }
 0x154   : > { %v566_v14 = vadd.f32 %v558_v51, %v477_v47  ;;  %v567_v23 = vadd.f32 %v559_v22, %v478_v50  ;;  %1016 = vrot.lane.b32.xlu0 %v1730_v43, %s1538_s26 }
 0x155   : > { %v867_v60 = vpop.permute.xlu1 %866  ;;  %v423_v1 = vpop.permute.xlu2 %422 }
 0x156   : > { %v575_v58 = vpop.permute.xlu0 %574  ;;  %v2065_v4 = vsel %vm870_vm5, %v859_v39, %v867_v60  ;;  %v2069_v0 = vsel %vm870_vm5, %v867_v60, %v859_v39 }
 0x157   : > { %v589_v12 = vsel %vm586_vm3, %v575_v58, %v583_v44  ;;  %v593_v18 = vsel %vm586_vm3, %v583_v44, %v575_v58 }
 0x158   : > { %v606_v7 = vmul.f32 %v1921_v62, %v593_v18  ;;  %v607_v43 = vmul.f32 %v1923_v55, %v589_v12  ;;  %v1374_v18 = vld [vmem:[%s2417_s3 + $0xe0] sm:$0xff] }
 0x15a   : > { %v639_v24 = vmul.f32 %v1800_v3, %v606_v7  ;;  %v640_v25 = vmul.f32 %v1800_v3, %v607_v43  ;;  %v1369_v7 = vld [vmem:[%s2417_s3 + $0xc0] sm:$0xff] }
 0x15b   : > { %1073 = vperm.xlu1 %1456, %v1381_v11   ;;  %992 = vperm.xlu2 %1457, %v1376_v21  }
 0x15c   : > { %v647_v26 = vadd.f32 %v639_v24, %v566_v14  ;;  %v648_v44 = vadd.f32 %v640_v25, %v567_v23  ;;  %1026 = vrot.lane.b32.xlu0 %v1738_v49, %s1538_s26 }
 0x15d   : > { %v415_v29 = vpop.permute.xlu1 %414  ;;  %v504_v32 = vpop.permute.xlu2 %503 }
 0x15e   : > { %v656_v39 = vpop.permute.xlu0 %655  ;;  %v430_v16 = vsel %vm426_vm1, %v415_v29, %v423_v1  ;;  %v434_v10 = vsel %vm426_vm1, %v423_v1, %v415_v29 }
 0x15f   : > { %v670_v40 = vsel %vm667_vm4, %v656_v39, %v664_v59  ;;  %v674_v3 = vsel %vm667_vm4, %v664_v59, %v656_v39  ;;  %v447_v51 = vmul.f32 %v1883_v33, %v434_v10  ;;  %v448_v22 = vmul.f32 %v1885_v34, %v430_v16  ;;  %v1380_v16 = vld [vmem:[%s2417_s3 + $0x108] sm:$0xff]  ;;  %v1382_v10 = vld [vmem:[%s2417_s3 + $0x118] sm:$0xff] }
 0x160   : > { %v687_v42 = vmul.f32 %v1941_v30, %v674_v3  ;;  %v688_v45 = vmul.f32 %v1943_v31, %v670_v40 }
 0x161   : > { %v479_v43 = vmul.f32 %v1778_v61, %v447_v51  ;;  %v480_v11 = vmul.f32 %v1778_v61, %v448_v22 }
 0x162   : > { %v720_v6 = vmul.f32 %v1814_v9, %v687_v42  ;;  %v721_v47 = vmul.f32 %v1814_v9, %v688_v45 }
 0x163   : > { %1018 = vrot.lane.b32.xlu1 %v1768_v57, %s1538_s26  ;;  %937 = vrot.lane.b32.xlu2 %v1768_v57, %s1537_s12 }
 0x164   : > { %v728_v50 = vadd.f32 %v720_v6, %v647_v26  ;;  %v729_v59 = vadd.f32 %v721_v47, %v648_v44  ;;  %1063 = vperm.xlu0 %1455, %v1379_v2   ;;  %v1363_v44 = vld [vmem:[%s2421_s7 + $0xa] sm:$0x3]  ;;  %v761_v6 = vmul.f32 %v1898_v41, %v1780_v63  ;;  %v762_v47 = vmul.f32 %v1898_v41, %v1752_v53 }
 0x165   : > { %v496_v14 = vpop.permute.xlu1 %495  ;;  %v585_v23 = vpop.permute.xlu2 %584  ;;  %v2149_v40 = vperm.slane %v1363_v44, 0  ;;  %v2151_v3 = vperm.slane %v1363_v44, 1  ;;  %v763_v44 = vmul.f32 %v1872_v28, %v1812_v8 }
 0x166   : > { %v786_v60 = vpop.permute.xlu0 %785  ;;  %v509_v9 = vsel %vm505_vm2, %v496_v14, %v504_v32  ;;  %v513_v1 = vsel %vm505_vm2, %v504_v32, %v496_v14 }
 0x167   : > { %v792_v58 = vsel %vm789_vm6, %v2042_v52, %v786_v60  ;;  %v796_v12 = vsel %vm789_vm6, %v786_v60, %v2042_v52  ;;  %v527_v33 = vmul.f32 %v1890_v35, %v513_v1  ;;  %v528_v34 = vmul.f32 %v1892_v36, %v509_v9  ;;  %v1100_v35 = vld [vmem:[%s2418_s4 + $0x18] sm:$0xff] }
 0x168   : > { %v809_v51 = vmul.f32 %v2149_v40, %v792_v58  ;;  %v810_v22 = vmul.f32 %v2151_v3, %v796_v12  ;;  %v769_v60 = vadd.f32 %v761_v6, %v728_v50  ;;  %v770_v9 = vadd.f32 %v762_v47, %v729_v59  ;;  %v1097_v58 = vld [vmem:[%s2418_s4] sm:$0xff] }
 0x169   : > { %v560_v21 = vmul.f32 %v1806_v5, %v527_v33  ;;  %v561_v52 = vmul.f32 %v1806_v5, %v528_v34 }
 0x16b   : > { %v568_v36 = vadd.f32 %v560_v21, %v479_v43  ;;  %v569_v24 = vadd.f32 %v561_v52, %v480_v11  ;;  %982 = vperm.xlu1 %1456, %v1374_v18   ;;  %901 = vperm.xlu2 %1457, %v1369_v7   ;;  %v1148_v7 = vld [vmem:[%s2420_s6 + $0x18] sm:$0xff] }
 0x16c   : > { %1118 = vperm.xlu0 %1455, %v1100_v35  }
 0x16d   : > { %v577_v25 = vpop.permute.xlu1 %576  ;;  %v666_v26 = vpop.permute.xlu2 %665 }
 0x16e   : > { %v861_v61 = vpop.permute.xlu0 %860  ;;  %v590_v29 = vsel %vm586_vm3, %v577_v25, %v585_v23  ;;  %v594_v5 = vsel %vm586_vm3, %v585_v23, %v577_v25  ;;  %v1146_v25 = vld [vmem:[%s2420_s6 + $0x8] sm:$0xff] }
 0x16f   : > { %v608_v32 = vmul.f32 %v1921_v62, %v594_v5  ;;  %v609_v39 = vmul.f32 %v1923_v55, %v590_v29  ;;  %v1145_v62 = vld [vmem:[%s2420_s6] sm:$0xff] }
 0x171   : > { %v641_v42 = vmul.f32 %v1834_v15, %v608_v32  ;;  %v642_v45 = vmul.f32 %v1834_v15, %v609_v39 }
 0x173   : > { %v649_v55 = vadd.f32 %v641_v42, %v568_v36  ;;  %v650_v2 = vadd.f32 %v642_v45, %v569_v24  ;;  %1068 = vperm.xlu1 %1456, %v1380_v16   ;;  %1078 = vperm.xlu2 %1457, %v1382_v10  }
 0x174   : > { %1151 = vperm.xlu0 %1455, %v1145_v62   ;;  %v1368_v62 = vld [vmem:[%s2421_s7 + $0xc] sm:$0x3] }
 0x175   : > { %v658_v15 = vpop.permute.xlu1 %657  ;;  %v780_v14 = vpop.permute.xlu2 %779 }
 0x176   : > { %v831_v23 = vpop.permute.xlu0 %830  ;;  %v671_v1 = vsel %vm667_vm4, %v658_v15, %v666_v26  ;;  %v675_v33 = vsel %vm667_vm4, %v666_v26, %v658_v15  ;;  %v1375_v26 = vld [vmem:[%s2417_s3 + $0xe8] sm:$0xff] }
 0x177   : > { %v842_v63 = vmul.f32 %v831_v23, %v809_v51  ;;  %v843_v34 = vmul.f32 %v831_v23, %v810_v22  ;;  %v689_v53 = vmul.f32 %v1941_v30, %v675_v33  ;;  %v690_v41 = vmul.f32 %v1943_v31, %v671_v1  ;;  %v1098_v1 = vld [vmem:[%s2418_s4 + $0x8] sm:$0xff] }
 0x179   : > { %v2173_v12 = vadd.f32 %v842_v63, %v769_v60  ;;  %v2175_v50 = vadd.f32 %v843_v34, %v770_v9  ;;  %v722_v59 = vmul.f32 %v1868_v27, %v689_v53  ;;  %v723_v18 = vmul.f32 %v1868_v27, %v690_v41 }
 0x17b   : > { %v730_v43 = vadd.f32 %v722_v59, %v649_v55  ;;  %v731_v30 = vadd.f32 %v723_v18, %v650_v2  ;;  %1103 = vperm.xlu1 %1456, %v1097_v58   ;;  %1024 = vrot.lane.b32.xlu2 %v1736_v48, %s1538_s26  ;;  %v2222_v2 = vperm.slane %v1368_v62, 1  ;;  %s2363_s26 = scalar_lea.vmem [#allocation2], %s1329_s21 }
 0x17c   : > { %1166 = vperm.xlu0 %1455, %v1148_v7   ;;  %s1260_s18 = sshll.u32 %s2363_s26, 4  ;;  %s1261_s18 = int_to_ptr.vmem [resolvable:$true] %s1260_s18 }
 0x17d   : > { %v788_v31 = vpop.permute.xlu1 %787  ;;  %v869_v11 = vpop.permute.xlu2 %868  ;;  %v771_v16 = vadd.f32 %v763_v44, %v730_v43  ;;  %v891_v53 = vmul.f32 %v2222_v2, %v2069_v0 }
 0x17e   : > { %v784_v21 = vpop.permute.xlu0 %783  ;;  %v793_v52 = vsel %vm789_vm6, %v780_v14, %v788_v31  ;;  %v797_v27 = vsel %vm789_vm6, %v788_v31, %v780_v14  ;;  %v874_v35 = vsel %vm870_vm5, %v861_v61, %v869_v11  ;;  %v878_v36 = vsel %vm870_vm5, %v869_v11, %v861_v61 }
 0x17f   : > { %v2195_v48 = vsel %vm789_vm6, %v2002_v46, %v784_v21  ;;  %v2200_v24 = vsel %vm789_vm6, %v784_v21, %v2002_v46  ;;  %v764_v61 = vmul.f32 %v1872_v28, %v1838_v17  ;;  %v811_v29 = vmul.f32 %v2149_v40, %v793_v52  ;;  %v1099_v17 = vld [vmem:[%s2418_s4 + $0x10] sm:$0xff] }
 0x180   : > { %v812_v46 = vmul.f32 %v2151_v3, %v797_v27  ;;  %v2220_v28 = vperm.slane %v1368_v62, 0  ;;  %v893_v47 = vmul.f32 %v2222_v2, %v878_v36 }
 0x181   : > { %v772_v10 = vadd.f32 %v764_v61, %v731_v30 }
 0x182   : > { %v892_v6 = vmul.f32 %v2220_v28, %v874_v35  ;;  %v890_v34 = vmul.f32 %v2220_v28, %v2065_v4  ;;  %v1147_v4 = vld [vmem:[%s2420_s6 + $0x10] sm:$0xff] }
 0x183   : > { %1156 = vperm.xlu1 %1456, %v1146_v25   ;;  %987 = vperm.xlu2 %1457, %v1375_v26  }
 0x185   : > { %v836_v5 = vpop.permute.xlu1 %835  ;;  %v782_v32 = vpop.permute.xlu2 %781 }
 0x186   : > { %v948_v39 = vpop.permute.xlu0 %947  ;;  %v844_v42 = vmul.f32 %v836_v5, %v811_v29  ;;  %v845_v45 = vmul.f32 %v836_v5, %v812_v46  ;;  %v1373_v5 = vld [vmem:[%s2421_s7 + $0xe] sm:$0x3] }
 0x188   : > { %v852_v55 = vadd.f32 %v844_v42, %v771_v16  ;;  %v853_v8 = vadd.f32 %v845_v45, %v772_v10  ;;  %v2268_v10 = vperm.slane %v1373_v5, 0 }
 0x18b   : > { %1113 = vperm.xlu2 %1457, %v1099_v17  }
 0x18d   : > { %v940_v51 = vpop.permute.xlu1 %939  ;;  %v942_v22 = vpop.permute.xlu2 %941 }
 0x18e   : > { %v917_v15 = vpop.permute.xlu0 %916  ;;  %v954_v14 = vsel %vm951_vm7, %v940_v51, %v948_v39  ;;  %v958_v23 = vsel %vm951_vm7, %v948_v39, %v940_v51  ;;  %v807_v51 = vmul.f32 %v2149_v40, %v2195_v48 }
 0x18f   : > { %v925_v60 = vmul.f32 %v917_v15, %v892_v6  ;;  %v926_v9 = vmul.f32 %v917_v15, %v893_v47  ;;  %v971_v15 = vmul.f32 %v2268_v10, %v954_v14 }
 0x191   : > { %v933_v33 = vadd.f32 %v925_v60, %v852_v55  ;;  %v934_v63 = vadd.f32 %v926_v9, %v853_v8 }
 0x193   : > { %1108 = vperm.xlu2 %1457, %v1098_v1  }
 0x195   : > { %v950_v41 = vpop.permute.xlu1 %949  ;;  %v912_v58 = vpop.permute.xlu2 %911 }
 0x196   : > { %v863_v59 = vpop.permute.xlu0 %862  ;;  %v955_v18 = vsel %vm951_vm7, %v942_v22, %v950_v41  ;;  %v959_v7 = vsel %vm951_vm7, %v950_v41, %v942_v22  ;;  %v923_v43 = vmul.f32 %v912_v58, %v890_v34  ;;  %v924_v30 = vmul.f32 %v912_v58, %v891_v53 }
 0x197   : > { %v808_v22 = vmul.f32 %v2151_v3, %v2200_v24 }
 0x198   : > { %v931_v31 = vadd.f32 %v923_v43, %v2173_v12  ;;  %v932_v11 = vadd.f32 %v924_v30, %v2175_v50  ;;  %v790_v12 = vsel %vm789_vm6, %v1947_v37, %v782_v32  ;;  %v794_v50 = vsel %vm789_vm6, %v782_v32, %v1947_v37 }
 0x199   : > { %v805_v36 = vmul.f32 %v2149_v40, %v790_v12  ;;  %v806_v25 = vmul.f32 %v2151_v3, %v794_v50  ;;  %v2270_v37 = vperm.slane %v1373_v5, 1  ;;  %v973_v32 = vmul.f32 %v2268_v10, %v955_v18 }
 0x19b   : > { %1161 = vperm.xlu2 %1457, %v1147_v4   ;;  %v974_v42 = vmul.f32 %v2270_v37, %v959_v7  ;;  %v972_v60 = vmul.f32 %v2270_v37, %v958_v23 }
 0x19d   : > { %v855_v0 = vpop.permute.xlu1 %854  ;;  %v857_v21 = vpop.permute.xlu2 %856 }
 0x19e   : > { %v2247_v52 = vpop.permute.xlu0 %1022  ;;  %v871_v27 = vsel %vm870_vm5, %v855_v0, %v863_v59  ;;  %v875_v35 = vsel %vm870_vm5, %v863_v59, %v855_v0 }
 0x1a5   : > { %v865_v26 = vpop.permute.xlu1 %864  ;;  %v2261_v44 = vpop.permute.xlu2 %1020 }
 0x1a6   : > { %v821_v61 = vpop.permute.xlu0 %820  ;;  %v872_v24 = vsel %vm870_vm5, %v857_v21, %v865_v26 }
 0x1a7   : > { %v838_v29 = vmul.f32 %v821_v61, %v805_v36  ;;  %v839_v46 = vmul.f32 %v821_v61, %v806_v25 }
 0x1a9   : > { %v846_v39 = vadd.f32 %v838_v29, %v1967_v54  ;;  %v847_v16 = vadd.f32 %v839_v46, %v1969_v56  ;;  %v759_v54 = vmul.f32 %v1832_v13, %v1768_v57  ;;  %v760_v56 = vmul.f32 %v1832_v13, %v1738_v49  ;;  %v1378_v46 = vld [vmem:[%s2421_s7 + $0x10] sm:$0x3] }
 0x1ab   : > { %v767_v1 = vadd.f32 %v759_v54, %v2034_v38  ;;  %v876_v38 = vsel %vm870_vm5, %v865_v26, %v857_v21 }
 0x1ac   : > { %v889_v14 = vmul.f32 %v2222_v2, %v876_v38 }
 0x1ad   : > { %v1029_v45 = vpop.permute.xlu1 %1028  ;;  %v1031_v62 = vpop.permute.xlu2 %1030 }
 0x1ae   : > { %v998_v55 = vpop.permute.xlu0 %997 }
 0x1af   : > { %v1006_v8 = vmul.f32 %v998_v55, %v973_v32  ;;  %v1007_v17 = vmul.f32 %v998_v55, %v974_v42  ;;  %v1036_v32 = vsel %vm1032_vm8, %v2247_v52, %v1031_v62  ;;  %v1039_v42 = vsel %vm1032_vm8, %v1029_v45, %v2261_v44 }
 0x1b1   : > { %v2274_v6 = vadd.f32 %v1006_v8, %v933_v33  ;;  %v2276_v47 = vadd.f32 %v1007_v17, %v934_v63  ;;  %v768_v33 = vadd.f32 %v760_v56, %v2036_v19  ;;  %v888_v19 = vmul.f32 %v2220_v28, %v872_v24 }
 0x1b5   : > { %v826_v9 = vpop.permute.xlu1 %825  ;;  %v993_v63 = vpop.permute.xlu2 %992 }
 0x1b6   : > { %v944_v57 = vpop.permute.xlu0 %943  ;;  %v840_v34 = vmul.f32 %v826_v9, %v807_v51  ;;  %v841_v53 = vmul.f32 %v826_v9, %v808_v22  ;;  %v1004_v49 = vmul.f32 %v993_v63, %v971_v15  ;;  %v1005_v13 = vmul.f32 %v993_v63, %v972_v60 }
 0x1b8   : > { %v848_v41 = vadd.f32 %v840_v34, %v767_v1  ;;  %v849_v40 = vadd.f32 %v841_v53, %v768_v33  ;;  %v2290_v48 = vadd.f32 %v1004_v49, %v931_v31  ;;  %v2292_v3 = vadd.f32 %v1005_v13, %v932_v11 }
 0x1b9   : > { %v886_v31 = vmul.f32 %v2220_v28, %v871_v27  ;;  %v887_v11 = vmul.f32 %v2222_v2, %v875_v35  ;;  %v1044_v2 = vperm.slane %v1378_v46, 0  ;;  %v1045_v35 = vperm.slane %v1378_v46, 1 }
 0x1bb   : > { %v1054_v55 = vmul.f32 %v1044_v2, %v1036_v32  ;;  %v1053_v15 = vmul.f32 %v1045_v35, %v1039_v42 }
 0x1bd   : > { %v936_v23 = vpop.permute.xlu1 %935  ;;  %v938_v58 = vpop.permute.xlu2 %937 }
 0x1be   : > { %v907_v59 = vpop.permute.xlu0 %906  ;;  %v952_v17 = vsel %vm951_vm7, %v936_v23, %v944_v57  ;;  %v956_v54 = vsel %vm951_vm7, %v944_v57, %v936_v23 }
 0x1bf   : > { %v921_v18 = vmul.f32 %v907_v59, %v888_v19  ;;  %v922_v7 = vmul.f32 %v907_v59, %v889_v14  ;;  %v967_v60 = vmul.f32 %v2268_v10, %v952_v17  ;;  %v968_v9 = vmul.f32 %v2270_v37, %v956_v54 }
 0x1c1   : > { %v2300_v43 = vadd.f32 %v921_v18, %v848_v41  ;;  %v2302_v30 = vadd.f32 %v922_v7, %v849_v40 }
 0x1c5   : > { %v946_v4 = vpop.permute.xlu1 %945  ;;  %v902_v0 = vpop.permute.xlu2 %901 }
 0x1c6   : > { %v1017_v21 = vpop.permute.xlu0 %1016  ;;  %v919_v12 = vmul.f32 %v902_v0, %v886_v31  ;;  %v920_v50 = vmul.f32 %v902_v0, %v887_v11  ;;  %v953_v33 = vsel %vm951_vm7, %v938_v58, %v946_v4  ;;  %v957_v63 = vsel %vm951_vm7, %v946_v4, %v938_v58 }
 0x1c8   : > { %v927_v36 = vadd.f32 %v919_v12, %v846_v39  ;;  %v928_v25 = vadd.f32 %v920_v50, %v847_v16  ;;  %v1040_v39 = vsel %vm1032_vm8, %v1031_v62, %v2247_v52  ;;  %v1035_v16 = vsel %vm1032_vm8, %v2261_v44, %v1029_v45 }
 0x1c9   : > { %v1055_v8 = vmul.f32 %v1045_v35, %v1040_v39  ;;  %v1052_v62 = vmul.f32 %v1044_v2, %v1035_v16 }
 0x1cd   : > { %v1074_v26 = vpop.permute.xlu1 %1073  ;;  %v1079_v61 = vpop.permute.xlu2 %1078 }
 0x1ce   : > { %v1027_v29 = vpop.permute.xlu0 %1026  ;;  %v1087_v56 = vmul.f32 %v1079_v61, %v1054_v55  ;;  %v1088_v51 = vmul.f32 %v1079_v61, %v1055_v8  ;;  %v1085_v1 = vmul.f32 %v1074_v26, %v1052_v62  ;;  %v1086_v44 = vmul.f32 %v1074_v26, %v1053_v15  ;;  %v1404_v62 = vld [vmem:[%s2419_s5 + $0x8] sm:$0xff] }
 0x1d0   : > { %v1095_v57 = vadd.f32 %v1087_v56, %v2274_v6  ;;  %v1096_v34 = vadd.f32 %v1088_v51, %v2276_v47  ;;  %v969_v6 = vmul.f32 %v2268_v10, %v953_v33  ;;  %v970_v47 = vmul.f32 %v2270_v37, %v957_v63  ;;  %v1459_v63 = vld [vmem:[%s1647_s10 + $0x8] sm:$0xff] }
 0x1d1   : > { %v1093_v14 = vadd.f32 %v1085_v1, %v2290_v48  ;;  %v1094_v23 = vadd.f32 %v1086_v44, %v2292_v3 }
 0x1d5   : > { %v1019_v5 = vpop.permute.xlu1 %1018  ;;  %v1025_v28 = vpop.permute.xlu2 %1024 }
 0x1d6   : > { %v1064_v27 = vpop.permute.xlu0 %1063  ;;  %v1034_v53 = vsel %vm1032_vm8, %v1019_v5, %v1027_v29  ;;  %v1038_v49 = vsel %vm1032_vm8, %v1027_v29, %v1019_v5  ;;  %v1033_v13 = vsel %vm1032_vm8, %v1017_v21, %v1025_v28  ;;  %v1037_v41 = vsel %vm1032_vm8, %v1025_v28, %v1017_v21 }
 0x1d7   : > { %v1050_v58 = vmul.f32 %v1044_v2, %v1034_v53  ;;  %v1051_v59 = vmul.f32 %v1045_v35, %v1038_v49  ;;  %v1048_v18 = vmul.f32 %v1044_v2, %v1033_v13  ;;  %v1049_v7 = vmul.f32 %v1045_v35, %v1037_v41 }
 0x1d9   : > { %v1081_v46 = vmul.f32 %v1064_v27, %v1048_v18  ;;  %v1082_v3 = vmul.f32 %v1064_v27, %v1049_v7 }
 0x1dd   : > { %v983_v22 = vpop.permute.xlu1 %982  ;;  %v988_v52 = vpop.permute.xlu2 %987 }
 0x1de   : > { %v1119_v45 = vpop.permute.xlu0 %1118  ;;  %v1000_v38 = vmul.f32 %v983_v22, %v967_v60  ;;  %v1001_v19 = vmul.f32 %v983_v22, %v968_v9  ;;  %v1002_v20 = vmul.f32 %v988_v52, %v969_v6  ;;  %v1003_v4 = vmul.f32 %v988_v52, %v970_v47  ;;  %v1403_v52 = vld [vmem:[%s2419_s5] sm:$0xff]  ;;  %v1461_v6 = vld [vmem:[%s1647_s10 + $0x18] sm:$0xff] }
 0x1df   : > { %v1127_v40 = vadd.f32 %v1119_v45, %v1095_v57  ;;  %v1128_v24 = vadd.f32 %v1119_v45, %v1096_v34  ;;  %v1458_v45 = vld [vmem:[%s1647_s10] sm:$0xff] }
 0x1e0   : > { %v1008_v12 = vadd.f32 %v1000_v38, %v927_v36  ;;  %v1009_v50 = vadd.f32 %v1001_v19, %v928_v25  ;;  %v1010_v5 = vadd.f32 %v1002_v20, %v2300_v43  ;;  %v1011_v28 = vadd.f32 %v1003_v4, %v2302_v30  ;;  %v1460_v38 = vld [vmem:[%s1647_s10 + $0x10] sm:$0xff]  ;;  %v1463_v4 = vld [vmem:[%s1647_s10 + $0x28] sm:$0xff] }
 0x1e1   : > { %v1135_v26 = vmax.f32 %v1127_v40, 0.0  ;;  %v1136_v10 = vmax.f32 %v1128_v24, 0.0 }
 0x1e2   : > { %v1089_v32 = vadd.f32 %v1081_v46, %v1008_v12  ;;  %v1090_v39 = vadd.f32 %v1082_v3, %v1009_v50  ;;  %v1465_v46 = vld [vmem:[%s1647_s10 + $0x38] sm:$0xff] }
 0x1e5   : > { %v1069_v31 = vpop.permute.xlu1 %1068  ;;  %v1114_v11 = vpop.permute.xlu2 %1113 }
 0x1e6   : > { %v1125_v0 = vadd.f32 %v1114_v11, %v1093_v14  ;;  %v1126_v21 = vadd.f32 %v1114_v11, %v1094_v23  ;;  %v1083_v61 = vmul.f32 %v1069_v31, %v1050_v58  ;;  %v1084_v37 = vmul.f32 %v1069_v31, %v1051_v59  ;;  %v1152_v15 = vpop.permute.xlu0 %1151  ;;  %v1462_v11 = vld [vmem:[%s1647_s10 + $0x20] sm:$0xff] }
 0x1e8   : > { %v1133_v29 = vmax.f32 %v1125_v0, 0.0  ;;  %v1134_v48 = vmax.f32 %v1126_v21, 0.0  ;;  %v1091_v36 = vadd.f32 %v1083_v61, %v1010_v5  ;;  %v1092_v25 = vadd.f32 %v1084_v37, %v1011_v28 }
 0x1ea   : > { %v1143_v2 = vpack.c.bf16 %v1135_v26, %v1133_v29  ;;  %v1144_v35 = vpack.c.bf16 %v1136_v10, %v1134_v48  ;;  %v1464_v29 = vld [vmem:[%s1647_s10 + $0x30] sm:$0xff]  ;;  %s1486_s10 = scalar_lea.hbm %s2422_s8, 128 }
 0x1eb   : > { %p1488_p1 = scmp.lt.s32.totalorder %s1486_s10, %s1482_s17 }
 0x1ec   : > { %1191 = vmatpush.bf16.msra.mxu2 %v1143_v2  ;;  %1210 = vmatpush.bf16.msra.mxu3 %v1144_v35 }
 0x1ed   : > { %v1104_v16 = vpop.permute.xlu1 %1103  ;;  %v1109_v42 = vpop.permute.xlu2 %1108  ;;  %p1489_p2 = por %p1488_p1, %p1487_p0 }
 0x1ee   : > { %v1121_v55 = vadd.f32 %v1104_v16, %v1089_v32  ;;  %v1122_v8 = vadd.f32 %v1104_v16, %v1090_v39  ;;  %v1123_v17 = vadd.f32 %v1109_v42, %v1091_v36  ;;  %v1124_v54 = vadd.f32 %v1109_v42, %v1092_v25  ;;  %v1167_v50 = vpop.permute.xlu0 %1166 }
 0x1ef   : > { %p1490_p3 = pnand %p1489_p2, %p1485_p13 }
 0x1f0   : > { %v1129_v27 = vmax.f32 %v1121_v55, 0.0  ;;  %v1130_v56 = vmax.f32 %v1122_v8, 0.0  ;;  %v1131_v43 = vmax.f32 %v1123_v17, 0.0  ;;  %v1132_v30 = vmax.f32 %v1124_v54, 0.0 }
 0x1f2   : > { %v1141_v51 = vpack.c.bf16 %v1131_v43, %v1129_v27  ;;  %v1142_v22 = vpack.c.bf16 %v1132_v30, %v1130_v56 }
 0x1f4   : > { %1192 = vmatpush.bf16.msra.mxu2 %v1141_v51  ;;  %1211 = vmatpush.bf16.msra.mxu3 %v1142_v22 }
 0x1f5   : > { %v1157_v49 = vpop.permute.xlu1 %1156  ;;  %v1162_v58 = vpop.permute.xlu2 %1161 }
 0x1f7   : > { %1391 = vmatmul.msk.bf16.vlgmr.msra.gmra.mxu2 %vm355_vm0, %v1403_v52  ;;  %1393 = vmatmul.msk.bf16.vlgmr.msra.gmra.mxu3 %vm355_vm0, %v1403_v52 }
 0x207   : > { %1392 = vmatmul.msk.bf16.gmra.mxu2 %vm355_vm0, %v1404_v62  ;;  %1394 = vmatmul.msk.bf16.gmra.mxu3 %vm355_vm0, %v1404_v62 }
 0x27a   : > { %v1194_v60 = vpop.f32.mrf.mxu2  ;;  %v1213_v9 = vpop.f32.mrf.mxu3 }
 0x27b   : > { %v1195_v1 = vadd.f32 %v1194_v60, %v1152_v15  ;;  %v1214_v44 = vadd.f32 %v1213_v9, %v1152_v15 }
 0x27d   : > { %v1223_v33 = vadd.f32 %v1458_v45, %v1195_v1  ;;  %v1224_v57 = vadd.f32 %v1459_v63, %v1214_v44 }
 0x27f   : > { %v1231_v34 = vmax.f32 %v1223_v33, 0.0  ;;  %v1232_v53 = vmax.f32 %v1224_v57, 0.0 }
 0x281   : > { %1239 = vst [vmem:[%s2363_s26] sm:$0xff] %v1231_v34 }
 0x282   : > { %1240 = vst [vmem:[%s2363_s26 + $0x8] sm:$0xff] %v1232_v53  ;;  %v1196_v13 = vpop.f32.mrf.mxu2  ;;  %v1215_v41 = vpop.f32.mrf.mxu3 }
 0x283   : > { %v1197_v40 = vadd.f32 %v1196_v13, %v1157_v49  ;;  %v1216_v24 = vadd.f32 %v1215_v41, %v1157_v49 }
 0x285   : > { %v1225_v19 = vadd.f32 %v1460_v38, %v1197_v40  ;;  %v1226_v47 = vadd.f32 %v1461_v6, %v1216_v24 }
 0x287   : > { %v1233_v14 = vmax.f32 %v1225_v19, 0.0  ;;  %v1234_v23 = vmax.f32 %v1226_v47, 0.0 }
 0x289   : > { %1241 = vst [vmem:[%s2363_s26 + $0x10] sm:$0xff] %v1233_v14 }
 0x28a   : > { %1242 = vst [vmem:[%s2363_s26 + $0x18] sm:$0xff] %v1234_v23  ;;  %v1199_v59 = vpop.f32.mrf.mxu2  ;;  %v1218_v18 = vpop.f32.mrf.mxu3 }
 0x28b   : > { %v1200_v7 = vadd.f32 %v1199_v59, %v1162_v58  ;;  %v1219_v31 = vadd.f32 %v1218_v18, %v1162_v58 }
 0x28d   : > { %v1227_v20 = vadd.f32 %v1462_v11, %v1200_v7  ;;  %v1228_v0 = vadd.f32 %v1463_v4, %v1219_v31 }
 0x28f   : > { %v1235_v21 = vmax.f32 %v1227_v20, 0.0  ;;  %v1236_v12 = vmax.f32 %v1228_v0, 0.0 }
 0x291   : > { %1243 = vst [vmem:[%s2363_s26 + $0x20] sm:$0xff] %v1235_v21 }
 0x292   : > { %1244 = vst [vmem:[%s2363_s26 + $0x28] sm:$0xff] %v1236_v12  ;;  %v1201_v26 = vpop.f32.mrf.mxu2  ;;  %v1220_v10 = vpop.f32.mrf.mxu3 }
 0x293   : > { %v1202_v61 = vadd.f32 %v1201_v26, %v1167_v50  ;;  %v1221_v37 = vadd.f32 %v1220_v10, %v1167_v50 }
 0x295   : > { %v1229_v48 = vadd.f32 %v1464_v29, %v1202_v61  ;;  %v1230_v3 = vadd.f32 %v1465_v46, %v1221_v37 }
 0x297   : > { %v1237_v5 = vmax.f32 %v1229_v48, 0.0  ;;  %v1238_v28 = vmax.f32 %v1230_v3, 0.0 }
 0x299   : > { %1245 = vst [vmem:[%s2363_s26 + $0x30] sm:$0xff] %v1237_v5 }
 0x29a   : > { %1246 = vst [vmem:[%s2363_s26 + $0x38] sm:$0xff] %v1238_v28 }
 0x29b   : > { %1493 = shalt.err (!%p1490_p3)
}
 0x29c   : > { %s1539_s20 = smov 256  }
 0x29d   : > { %1406 = dma.vmem_to_hbm [thread:$0]  (%p1623_p5), %s1261_s18, 1024, %s1263_s9, %s1248_s19, %s1539_s20, %s1539_s20, %s1531_s25  }
 0x29e PF: > { %p1412_p4 = scmp.ge.s32.totalorder %s1528_s30, 2  ;;  %s1277_s26 = sand.u32 1, %s1516_s27  }
 0x29f   : > { %s1278_s24 = scalar_lea.sflag [#allocation3], %s1277_s26 }
 0x2a0   : > { %p1409_p7 = pnand %p1412_p4, %p1627_p6 }
 0x2a2   : > { %p1410_p8 = pneg %p1409_p7 }
 0x2a4   : > { %1511 = dma.done.wait (%p1410_p8), %s1278_s24, 1024  }
 0x2a5   : > { %1513 = vsyncadd (%p1410_p8), %s1278_s24, 4294966272  ;;  %p18_p9 = scmp.ge.s32.totalorder %s1610_s11, 4   ;;  %s2425_s27 = smov %s1520_s28 }
 0x2a6   : > { %s2426_s28 = smov %s1524_s29  ;;  %s2427_s29 = smov %s1621_s14 }
 0x2a7   : > { %s2428_s30 = smov %s1610_s11  ;;  %20 = sbr.rel (!%p18_p9) target bundleno = 3 (0x3), region = 102 }
 0x2ac   :  { %1284 = vsyncpa [#allocation3], 1 }
 0x2ad   :  { %1286 = vsyncpa [#allocation3 + $0x1], 1 }

</bundles_post_ra>
